<compile_context>
chip_gen: v7x
topology: tpu7x:2x2x1
jax: 0.10.0
libtpu: 0.0.40
codegen_flags: <defaults>
</compile_context>

<pallas_src>
import functools
import math

import jax
import jax.numpy as jnp
import numpy as np
from jax.experimental import pallas as pl
from jax.experimental.pallas import tpu as pltpu

# ---- small shapes consistent with the module's forward -----------------------
BATCH = 2
SEQ = 8
HIDDEN = 32
HEAD_NUM = 4
HEAD_DIM = HIDDEN // HEAD_NUM      # 8
MLP_DIM = 4 * HIDDEN               # 128 (ViT-style 4x expansion, lane-dense)
LN_EPS = 1e-5                      # PyTorch nn.LayerNorm default

_HI = jax.lax.Precision.HIGHEST
_dot = functools.partial(jnp.dot, precision=_HI, preferred_element_type=jnp.float32)
_dotg = functools.partial(jax.lax.dot_general, precision=_HI,
                          preferred_element_type=jnp.float32)
_NT = (((1,), (1,)), ((), ()))     # A @ B.T  (no in-kernel transpose)
_NN = (((1,), (0,)), ((), ()))     # A @ B


def _layer_norm(t, g, b):
    mu = jnp.mean(t, axis=-1, keepdims=True)
    var = jnp.mean(jnp.square(t - mu), axis=-1, keepdims=True)
    return (t - mu) * jax.lax.rsqrt(var + LN_EPS) * g + b


def _erf(z):
    # Abramowitz & Stegun 7.1.26: |error| <= 1.5e-7 (~ f32 machine precision).
    # Uses only exp/abs/where/poly, all guaranteed to lower in Mosaic.
    a1, a2, a3, a4, a5 = 0.254829592, -0.284496736, 1.421413741, -1.453152027, 1.061405429
    p = 0.3275911
    az = jnp.abs(z)
    t = 1.0 / (1.0 + p * az)
    poly = ((((a5 * t + a4) * t + a3) * t + a2) * t + a1) * t
    e = 1.0 - poly * jnp.exp(-az * az)
    return jnp.where(z >= 0.0, e, -e)


def _gelu_erf(t):
    # Exact-erf GELU (PyTorch nn.GELU default), not the tanh approximation.
    return 0.5 * t * (1.0 + _erf(t * (1.0 / math.sqrt(2.0))))


def encoder_layer_kernel(x_ref, bias_ref,
                         g1_ref, b1_ref,
                         wq_ref, bq_ref, wk_ref, bk_ref, wv_ref, bv_ref,
                         wo_ref, bo_ref,
                         g2_ref, b2_ref,
                         w1_ref, bm1_ref, w2_ref, bm2_ref,
                         o_ref):
    """Single invocation, no grid, everything resident in VMEM.

    x_ref    : (B*S, H)    residual stream (pre-LN input)
    bias_ref : (B*S, B*S)  additive block-diagonal mask (0 same-batch, -1e30 cross)
    wq/wk/wv : (H, H)      pre-transposed projections (in, out)
    wo_ref   : (H, H)      pre-transposed output projection
    w1_ref   : (H, M)      pre-transposed MLP fc1;  w2_ref : (M, H) fc2
    biases / LN params : (1, dim)
    o_ref    : (B*S, H)
    """
    x_in = x_ref[...]                                     # (B*S, H) f32

    # ---- LN1 + Q/K/V projections (each lands at lane 0) ----------------------
    xn = _layer_norm(x_in, g1_ref[...], b1_ref[...])
    q = _dot(xn, wq_ref[...]) + bq_ref[...]
    k = _dot(xn, wk_ref[...]) + bk_ref[...]
    v = _dot(xn, wv_ref[...]) + bv_ref[...]

    # ---- attention: all B*S rows per head; cross-batch killed by bias --------
    bias = bias_ref[...]                                  # (B*S, B*S)
    scale = 1.0 / math.sqrt(HEAD_DIM)
    attn = jnp.zeros(x_in.shape, jnp.float32)
    for h in range(HEAD_NUM):                             # static unroll, 4 heads
        lo = h * HEAD_DIM
        hi = lo + HEAD_DIM
        s = _dotg(q[:, lo:hi], k[:, lo:hi], _NT) * scale + bias
        s = s - jnp.max(s, axis=-1, keepdims=True)        # stable softmax
        p = jnp.exp(s)
        p = p / jnp.sum(p, axis=-1, keepdims=True)        # exact division (VPU slack)
        ho = _dotg(p, v[:, lo:hi], _NN)                   # (B*S, HEAD_DIM)
        # concat-free o_proj: sum_h head_h @ Wo_T[h*d:(h+1)*d, :]  (sublane-aligned)
        attn = attn + _dot(ho, wo_ref[lo:hi, :])
    attn = attn + bo_ref[...]

    # residual 1 (dropout = identity at inference)
    x1 = x_in + attn

    # ---- LN2 + MLP (fc1 -> GELU -> fc2) + residual 2 --------------------------
    yn = _layer_norm(x1, g2_ref[...], b2_ref[...])
    h1 = _gelu_erf(_dot(yn, w1_ref[...]) + bm1_ref[...])  # (B*S, 128), lane-dense
    y = _dot(h1, w2_ref[...]) + bm2_ref[...]

    o_ref[...] = (x1 + y).astype(o_ref.dtype)


def prepare_encoder_params(g1, be1, wq, bq, wk, bk, wv, bv, wo, bo,
                           g2, be2, w1, bm1, w2, bm2):
    """One-time prep (hoisted out of the per-call path): pre-transpose weights
    to (in, out), reshape biases/LN params to (1, dim) tiles, build the
    block-diagonal attention bias."""
    row = lambda t: jnp.asarray(t).reshape(1, -1)
    batch_id = np.arange(BATCH * SEQ) // SEQ
    attn_bias = jnp.asarray(
        np.where(batch_id[:, None] == batch_id[None, :], 0.0, -1e30),
        dtype=jnp.float32)
    return (attn_bias,
            row(g1), row(be1),
            wq.T, row(bq), wk.T, row(bk), wv.T, row(bv),
            wo.T, row(bo),
            row(g2), row(be2),
            w1.T, row(bm1), w2.T, row(bm2))


@jax.jit
def encoder_layer(x, params):
    """x: (B, S, H) f32, params from prepare_encoder_params. Returns (B, S, H)."""
    B, S, H = x.shape
    x2d = x.reshape(B * S, H)                             # fold batch into rows

    vmem = pl.BlockSpec(memory_space=pltpu.MemorySpace.VMEM)
    out2d = pl.pallas_call(
        encoder_layer_kernel,
        out_shape=jax.ShapeDtypeStruct((B * S, H), x.dtype),
        in_specs=[vmem] * (1 + len(params)),              # whole arrays in VMEM, no grid
        out_specs=vmem,
        compiler_params=pltpu.CompilerParams(
            vmem_limit_bytes=32 * 1024 * 1024),           # explicit scoped-VMEM budget
    )(x2d, *params)
    return out2d.reshape(B, S, H)


def encoder_layer_reference(x, g1, be1, wq, bq, wk, bk, wv, bv, wo, bo,
                            g2, be2, w1, bm1, w2, bm2):
    """Pure-JAX reference mirroring the PyTorch EncoderLayer (eval mode)."""
    B, S, H = x.shape

    def ln(t, g, b):
        mu = jnp.mean(t, axis=-1, keepdims=True)
        var = jnp.mean(jnp.square(t - mu), axis=-1, keepdims=True)
        return (t - mu) / jnp.sqrt(var + LN_EPS) * g + b

    xn = ln(x, g1, be1)
    q = xn @ wq.T + bq
    k = xn @ wk.T + bk
    v = xn @ wv.T + bv
    split = lambda t: t.reshape(B, S, HEAD_NUM, HEAD_DIM).transpose(0, 2, 1, 3)
    qh, kh, vh = split(q), split(k), split(v)
    aw = jnp.einsum('bhqd,bhkd->bhqk', qh, kh) / math.sqrt(HEAD_DIM)
    aw = jax.nn.softmax(aw, axis=-1)
    sc = jnp.einsum('bhqk,bhkd->bhqd', aw, vh)
    sc = sc.transpose(0, 2, 1, 3).reshape(B, S, H)
    x1 = x + (sc @ wo.T + bo)
    yn = ln(x1, g2, be2)
    h = jax.nn.gelu(yn @ w1.T + bm1, approximate=False)   # exact erf GELU (spec)
    y = h @ w2.T + bm2
    return x1 + y


if __name__ == "__main__":
    key = jax.random.PRNGKey(0)
    keys = jax.random.split(key, 17)

    x = jax.random.normal(keys[0], (BATCH, SEQ, HIDDEN), dtype=jnp.float32)

    def init_linear(kw, kb, out_f, in_f):
        w = jax.random.normal(kw, (out_f, in_f), dtype=jnp.float32) * 0.05
        b = jax.random.normal(kb, (out_f,), dtype=jnp.float32) * 0.05
        return w, b

    wq, bq = init_linear(keys[1], keys[2], HIDDEN, HIDDEN)
    wk, bk = init_linear(keys[3], keys[4], HIDDEN, HIDDEN)
    wv, bv = init_linear(keys[5], keys[6], HIDDEN, HIDDEN)
    wo, bo = init_linear(keys[7], keys[8], HIDDEN, HIDDEN)
    w1, bm1 = init_linear(keys[9], keys[10], MLP_DIM, HIDDEN)
    w2, bm2 = init_linear(keys[11], keys[12], HIDDEN, MLP_DIM)
    g1 = 1.0 + 0.1 * jax.random.normal(keys[13], (HIDDEN,), dtype=jnp.float32)
    be1 = 0.1 * jax.random.normal(keys[14], (HIDDEN,), dtype=jnp.float32)
    g2 = 1.0 + 0.1 * jax.random.normal(keys[15], (HIDDEN,), dtype=jnp.float32)
    be2 = 0.1 * jax.random.normal(keys[16], (HIDDEN,), dtype=jnp.float32)

    weights = (g1, be1, wq, bq, wk, bk, wv, bv, wo, bo, g2, be2, w1, bm1, w2, bm2)

    params = prepare_encoder_params(*weights)             # one-time weight prep
    out = encoder_layer(x, params)
    out = jax.block_until_ready(out)

    with jax.default_matmul_precision("float32"):         # full-f32 reference matmuls
        ref = encoder_layer_reference(x, *weights)
    ref = jax.block_until_ready(ref)

    # Exact softmax division + erf GELU + HIGHEST-precision matmuls: tolerance
    # tightened from 5e-3 to 1e-4 (remaining slack = transcendental ulp noise).
    np.testing.assert_allclose(np.asarray(out), np.asarray(ref),
                               rtol=1e-4, atol=1e-4)

    print("KERNEL_OK")
</pallas_src>

<mosaic_0001>
module attributes {stable_mosaic.version = 11 : i64} {
  func.func @encoder_layer_kernel(%arg0: memref<16x32xf32, #tpu.memory_space<vmem>>, %arg1: memref<16x16xf32, #tpu.memory_space<vmem>>, %arg2: memref<1x32xf32, #tpu.memory_space<vmem>>, %arg3: memref<1x32xf32, #tpu.memory_space<vmem>>, %arg4: memref<32x32xf32, #tpu.memory_space<vmem>>, %arg5: memref<1x32xf32, #tpu.memory_space<vmem>>, %arg6: memref<32x32xf32, #tpu.memory_space<vmem>>, %arg7: memref<1x32xf32, #tpu.memory_space<vmem>>, %arg8: memref<32x32xf32, #tpu.memory_space<vmem>>, %arg9: memref<1x32xf32, #tpu.memory_space<vmem>>, %arg10: memref<32x32xf32, #tpu.memory_space<vmem>>, %arg11: memref<1x32xf32, #tpu.memory_space<vmem>>, %arg12: memref<1x32xf32, #tpu.memory_space<vmem>>, %arg13: memref<1x32xf32, #tpu.memory_space<vmem>>, %arg14: memref<32x128xf32, #tpu.memory_space<vmem>>, %arg15: memref<1x128xf32, #tpu.memory_space<vmem>>, %arg16: memref<128x32xf32, #tpu.memory_space<vmem>>, %arg17: memref<1x32xf32, #tpu.memory_space<vmem>>, %arg18: memref<16x32xf32, #tpu.memory_space<vmem>>) attributes {dimension_semantics = [], scalar_prefetch = 0 : i64, scratch_operands = 0 : i64, tpu.core_type = #tpu.core_type<tc>} {
    %c0 = arith.constant 0 : index
    %c0_0 = arith.constant 0 : index
    %0 = vector.load %arg0[%c0, %c0_0] : memref<16x32xf32, #tpu.memory_space<vmem>>, vector<16x32xf32>
    %c0_1 = arith.constant 0 : index
    %c0_2 = arith.constant 0 : index
    %1 = vector.load %arg2[%c0_1, %c0_2] : memref<1x32xf32, #tpu.memory_space<vmem>>, vector<1x32xf32>
    %c0_3 = arith.constant 0 : index
    %c0_4 = arith.constant 0 : index
    %2 = vector.load %arg3[%c0_3, %c0_4] : memref<1x32xf32, #tpu.memory_space<vmem>>, vector<1x32xf32>
    %cst = arith.constant dense<0.000000e+00> : vector<16xf32>
    %3 = vector.multi_reduction <add>, %0, %cst [1] : vector<16x32xf32> to vector<16xf32>
    %4 = vector.shape_cast %3 : vector<16xf32> to vector<16x1xf32>
    %cst_5 = arith.constant 3.200000e+01 : f32
    %5 = vector.broadcast %cst_5 : f32 to vector<16x1xf32>
    %6 = arith.divf %4, %5 : vector<16x1xf32>
    %7 = vector.broadcast %6 : vector<16x1xf32> to vector<16x32xf32>
    %8 = arith.subf %0, %7 : vector<16x32xf32>
    %9 = arith.mulf %8, %8 : vector<16x32xf32>
    %cst_6 = arith.constant dense<0.000000e+00> : vector<16xf32>
    %10 = vector.multi_reduction <add>, %9, %cst_6 [1] : vector<16x32xf32> to vector<16xf32>
    %11 = vector.shape_cast %10 : vector<16xf32> to vector<16x1xf32>
    %cst_7 = arith.constant 3.200000e+01 : f32
    %12 = vector.broadcast %cst_7 : f32 to vector<16x1xf32>
    %13 = arith.divf %11, %12 : vector<16x1xf32>
    %14 = vector.broadcast %6 : vector<16x1xf32> to vector<16x32xf32>
    %15 = arith.subf %0, %14 : vector<16x32xf32>
    %cst_8 = arith.constant 9.99999974E-6 : f32
    %16 = vector.broadcast %cst_8 : f32 to vector<16x1xf32>
    %17 = arith.addf %13, %16 : vector<16x1xf32>
    %18 = math.rsqrt %17 : vector<16x1xf32>
    %19 = vector.broadcast %18 : vector<16x1xf32> to vector<16x32xf32>
    %20 = arith.mulf %15, %19 : vector<16x32xf32>
    %21 = vector.broadcast %1 : vector<1x32xf32> to vector<16x32xf32>
    %22 = arith.mulf %20, %21 : vector<16x32xf32>
    %23 = vector.broadcast %2 : vector<1x32xf32> to vector<16x32xf32>
    %24 = arith.addf %22, %23 : vector<16x32xf32>
    %c0_9 = arith.constant 0 : index
    %c0_10 = arith.constant 0 : index
    %25 = vector.load %arg4[%c0_9, %c0_10] : memref<32x32xf32, #tpu.memory_space<vmem>>, vector<32x32xf32>
    %cst_11 = arith.constant dense<0.000000e+00> : vector<16x32xf32>
    %26 = tpu.matmul %24, %25, %cst_11 {dimension_numbers = #tpu.dot_dimension_numbers<[1], [0], [0], [1], [0, 0, 1, 1], [], []>, precision = #tpu.contract_precision<fp32>} : vector<16x32xf32>, vector<32x32xf32>, vector<16x32xf32> -> vector<16x32xf32>
    %c0_12 = arith.constant 0 : index
    %c0_13 = arith.constant 0 : index
    %27 = vector.load %arg5[%c0_12, %c0_13] : memref<1x32xf32, #tpu.memory_space<vmem>>, vector<1x32xf32>
    %28 = vector.broadcast %27 : vector<1x32xf32> to vector<16x32xf32>
    %29 = arith.addf %26, %28 : vector<16x32xf32>
    %c0_14 = arith.constant 0 : index
    %c0_15 = arith.constant 0 : index
    %30 = vector.load %arg6[%c0_14, %c0_15] : memref<32x32xf32, #tpu.memory_space<vmem>>, vector<32x32xf32>
    %cst_16 = arith.constant dense<0.000000e+00> : vector<16x32xf32>
    %31 = tpu.matmul %24, %30, %cst_16 {dimension_numbers = #tpu.dot_dimension_numbers<[1], [0], [0], [1], [0, 0, 1, 1], [], []>, precision = #tpu.contract_precision<fp32>} : vector<16x32xf32>, vector<32x32xf32>, vector<16x32xf32> -> vector<16x32xf32>
    %c0_17 = arith.constant 0 : index
    %c0_18 = arith.constant 0 : index
    %32 = vector.load %arg7[%c0_17, %c0_18] : memref<1x32xf32, #tpu.memory_space<vmem>>, vector<1x32xf32>
    %33 = vector.broadcast %32 : vector<1x32xf32> to vector<16x32xf32>
    %34 = arith.addf %31, %33 : vector<16x32xf32>
    %c0_19 = arith.constant 0 : index
    %c0_20 = arith.constant 0 : index
    %35 = vector.load %arg8[%c0_19, %c0_20] : memref<32x32xf32, #tpu.memory_space<vmem>>, vector<32x32xf32>
    %cst_21 = arith.constant dense<0.000000e+00> : vector<16x32xf32>
    %36 = tpu.matmul %24, %35, %cst_21 {dimension_numbers = #tpu.dot_dimension_numbers<[1], [0], [0], [1], [0, 0, 1, 1], [], []>, precision = #tpu.contract_precision<fp32>} : vector<16x32xf32>, vector<32x32xf32>, vector<16x32xf32> -> vector<16x32xf32>
    %c0_22 = arith.constant 0 : index
    %c0_23 = arith.constant 0 : index
    %37 = vector.load %arg9[%c0_22, %c0_23] : memref<1x32xf32, #tpu.memory_space<vmem>>, vector<1x32xf32>
    %38 = vector.broadcast %37 : vector<1x32xf32> to vector<16x32xf32>
    %39 = arith.addf %36, %38 : vector<16x32xf32>
    %c0_24 = arith.constant 0 : index
    %c0_25 = arith.constant 0 : index
    %40 = vector.load %arg1[%c0_24, %c0_25] : memref<16x16xf32, #tpu.memory_space<vmem>>, vector<16x16xf32>
    %cst_26 = arith.constant 0.000000e+00 : f32
    %41 = vector.broadcast %cst_26 : f32 to vector<16x32xf32>
    %42 = vector.extract_strided_slice %29 {offsets = [0, 0], sizes = [16, 8], strides = [1, 1]} : vector<16x32xf32> to vector<16x8xf32>
    %43 = vector.extract_strided_slice %34 {offsets = [0, 0], sizes = [16, 8], strides = [1, 1]} : vector<16x32xf32> to vector<16x8xf32>
    %cst_27 = arith.constant dense<0.000000e+00> : vector<16x16xf32>
    %44 = tpu.matmul %42, %43, %cst_27 {dimension_numbers = #tpu.dot_dimension_numbers<[1], [1], [0], [0], [0, 0, 1, 0], [], []>, precision = #tpu.contract_precision<fp32>} : vector<16x8xf32>, vector<16x8xf32>, vector<16x16xf32> -> vector<16x16xf32>
    %cst_28 = arith.constant 0.353553385 : f32
    %45 = vector.broadcast %cst_28 : f32 to vector<16x16xf32>
    %46 = arith.mulf %44, %45 : vector<16x16xf32>
    %47 = arith.addf %46, %40 : vector<16x16xf32>
    %cst_29 = arith.constant dense<0xFF800000> : vector<16xf32>
    %48 = vector.multi_reduction <maximumf>, %47, %cst_29 [1] : vector<16x16xf32> to vector<16xf32>
    %49 = vector.shape_cast %48 : vector<16xf32> to vector<16x1xf32>
    %50 = vector.broadcast %49 : vector<16x1xf32> to vector<16x16xf32>
    %51 = arith.subf %47, %50 : vector<16x16xf32>
    %52 = math.exp %51 : vector<16x16xf32>
    %cst_30 = arith.constant dense<0.000000e+00> : vector<16xf32>
    %53 = vector.multi_reduction <add>, %52, %cst_30 [1] : vector<16x16xf32> to vector<16xf32>
    %54 = vector.shape_cast %53 : vector<16xf32> to vector<16x1xf32>
    %55 = vector.broadcast %54 : vector<16x1xf32> to vector<16x16xf32>
    %56 = arith.divf %52, %55 : vector<16x16xf32>
    %57 = vector.extract_strided_slice %39 {offsets = [0, 0], sizes = [16, 8], strides = [1, 1]} : vector<16x32xf32> to vector<16x8xf32>
    %cst_31 = arith.constant dense<0.000000e+00> : vector<16x8xf32>
    %58 = tpu.matmul %56, %57, %cst_31 {dimension_numbers = #tpu.dot_dimension_numbers<[1], [0], [0], [1], [0, 0, 1, 1], [], []>, precision = #tpu.contract_precision<fp32>} : vector<16x16xf32>, vector<16x8xf32>, vector<16x8xf32> -> vector<16x8xf32>
    %c0_32 = arith.constant 0 : index
    %c0_33 = arith.constant 0 : index
    %59 = vector.load %arg10[%c0_32, %c0_33] : memref<32x32xf32, #tpu.memory_space<vmem>>, vector<8x32xf32>
    %cst_34 = arith.constant dense<0.000000e+00> : vector<16x32xf32>
    %60 = tpu.matmul %58, %59, %cst_34 {dimension_numbers = #tpu.dot_dimension_numbers<[1], [0], [0], [1], [0, 0, 1, 1], [], []>, precision = #tpu.contract_precision<fp32>} : vector<16x8xf32>, vector<8x32xf32>, vector<16x32xf32> -> vector<16x32xf32>
    %61 = arith.addf %41, %60 : vector<16x32xf32>
    %62 = vector.extract_strided_slice %29 {offsets = [0, 8], sizes = [16, 8], strides = [1, 1]} : vector<16x32xf32> to vector<16x8xf32>
    %63 = vector.extract_strided_slice %34 {offsets = [0, 8], sizes = [16, 8], strides = [1, 1]} : vector<16x32xf32> to vector<16x8xf32>
    %cst_35 = arith.constant dense<0.000000e+00> : vector<16x16xf32>
    %64 = tpu.matmul %62, %63, %cst_35 {dimension_numbers = #tpu.dot_dimension_numbers<[1], [1], [0], [0], [0, 0, 1, 0], [], []>, precision = #tpu.contract_precision<fp32>} : vector<16x8xf32>, vector<16x8xf32>, vector<16x16xf32> -> vector<16x16xf32>
    %cst_36 = arith.constant 0.353553385 : f32
    %65 = vector.broadcast %cst_36 : f32 to vector<16x16xf32>
    %66 = arith.mulf %64, %65 : vector<16x16xf32>
    %67 = arith.addf %66, %40 : vector<16x16xf32>
    %cst_37 = arith.constant dense<0xFF800000> : vector<16xf32>
    %68 = vector.multi_reduction <maximumf>, %67, %cst_37 [1] : vector<16x16xf32> to vector<16xf32>
    %69 = vector.shape_cast %68 : vector<16xf32> to vector<16x1xf32>
    %70 = vector.broadcast %69 : vector<16x1xf32> to vector<16x16xf32>
    %71 = arith.subf %67, %70 : vector<16x16xf32>
    %72 = math.exp %71 : vector<16x16xf32>
    %cst_38 = arith.constant dense<0.000000e+00> : vector<16xf32>
    %73 = vector.multi_reduction <add>, %72, %cst_38 [1] : vector<16x16xf32> to vector<16xf32>
    %74 = vector.shape_cast %73 : vector<16xf32> to vector<16x1xf32>
    %75 = vector.broadcast %74 : vector<16x1xf32> to vector<16x16xf32>
    %76 = arith.divf %72, %75 : vector<16x16xf32>
    %77 = vector.extract_strided_slice %39 {offsets = [0, 8], sizes = [16, 8], strides = [1, 1]} : vector<16x32xf32> to vector<16x8xf32>
    %cst_39 = arith.constant dense<0.000000e+00> : vector<16x8xf32>
    %78 = tpu.matmul %76, %77, %cst_39 {dimension_numbers = #tpu.dot_dimension_numbers<[1], [0], [0], [1], [0, 0, 1, 1], [], []>, precision = #tpu.contract_precision<fp32>} : vector<16x16xf32>, vector<16x8xf32>, vector<16x8xf32> -> vector<16x8xf32>
    %c8 = arith.constant 8 : index
    %c0_40 = arith.constant 0 : index
    %79 = vector.load %arg10[%c8, %c0_40] : memref<32x32xf32, #tpu.memory_space<vmem>>, vector<8x32xf32>
    %cst_41 = arith.constant dense<0.000000e+00> : vector<16x32xf32>
    %80 = tpu.matmul %78, %79, %cst_41 {dimension_numbers = #tpu.dot_dimension_numbers<[1], [0], [0], [1], [0, 0, 1, 1], [], []>, precision = #tpu.contract_precision<fp32>} : vector<16x8xf32>, vector<8x32xf32>, vector<16x32xf32> -> vector<16x32xf32>
    %81 = arith.addf %61, %80 : vector<16x32xf32>
    %82 = vector.extract_strided_slice %29 {offsets = [0, 16], sizes = [16, 8], strides = [1, 1]} : vector<16x32xf32> to vector<16x8xf32>
    %83 = vector.extract_strided_slice %34 {offsets = [0, 16], sizes = [16, 8], strides = [1, 1]} : vector<16x32xf32> to vector<16x8xf32>
    %cst_42 = arith.constant dense<0.000000e+00> : vector<16x16xf32>
    %84 = tpu.matmul %82, %83, %cst_42 {dimension_numbers = #tpu.dot_dimension_numbers<[1], [1], [0], [0], [0, 0, 1, 0], [], []>, precision = #tpu.contract_precision<fp32>} : vector<16x8xf32>, vector<16x8xf32>, vector<16x16xf32> -> vector<16x16xf32>
    %cst_43 = arith.constant 0.353553385 : f32
    %85 = vector.broadcast %cst_43 : f32 to vector<16x16xf32>
    %86 = arith.mulf %84, %85 : vector<16x16xf32>
    %87 = arith.addf %86, %40 : vector<16x16xf32>
    %cst_44 = arith.constant dense<0xFF800000> : vector<16xf32>
    %88 = vector.multi_reduction <maximumf>, %87, %cst_44 [1] : vector<16x16xf32> to vector<16xf32>
    %89 = vector.shape_cast %88 : vector<16xf32> to vector<16x1xf32>
    %90 = vector.broadcast %89 : vector<16x1xf32> to vector<16x16xf32>
    %91 = arith.subf %87, %90 : vector<16x16xf32>
    %92 = math.exp %91 : vector<16x16xf32>
    %cst_45 = arith.constant dense<0.000000e+00> : vector<16xf32>
    %93 = vector.multi_reduction <add>, %92, %cst_45 [1] : vector<16x16xf32> to vector<16xf32>
    %94 = vector.shape_cast %93 : vector<16xf32> to vector<16x1xf32>
    %95 = vector.broadcast %94 : vector<16x1xf32> to vector<16x16xf32>
    %96 = arith.divf %92, %95 : vector<16x16xf32>
    %97 = vector.extract_strided_slice %39 {offsets = [0, 16], sizes = [16, 8], strides = [1, 1]} : vector<16x32xf32> to vector<16x8xf32>
    %cst_46 = arith.constant dense<0.000000e+00> : vector<16x8xf32>
    %98 = tpu.matmul %96, %97, %cst_46 {dimension_numbers = #tpu.dot_dimension_numbers<[1], [0], [0], [1], [0, 0, 1, 1], [], []>, precision = #tpu.contract_precision<fp32>} : vector<16x16xf32>, vector<16x8xf32>, vector<16x8xf32> -> vector<16x8xf32>
    %c16 = arith.constant 16 : index
    %c0_47 = arith.constant 0 : index
    %99 = vector.load %arg10[%c16, %c0_47] : memref<32x32xf32, #tpu.memory_space<vmem>>, vector<8x32xf32>
    %cst_48 = arith.constant dense<0.000000e+00> : vector<16x32xf32>
    %100 = tpu.matmul %98, %99, %cst_48 {dimension_numbers = #tpu.dot_dimension_numbers<[1], [0], [0], [1], [0, 0, 1, 1], [], []>, precision = #tpu.contract_precision<fp32>} : vector<16x8xf32>, vector<8x32xf32>, vector<16x32xf32> -> vector<16x32xf32>
    %101 = arith.addf %81, %100 : vector<16x32xf32>
    %102 = vector.extract_strided_slice %29 {offsets = [0, 24], sizes = [16, 8], strides = [1, 1]} : vector<16x32xf32> to vector<16x8xf32>
    %103 = vector.extract_strided_slice %34 {offsets = [0, 24], sizes = [16, 8], strides = [1, 1]} : vector<16x32xf32> to vector<16x8xf32>
    %cst_49 = arith.constant dense<0.000000e+00> : vector<16x16xf32>
    %104 = tpu.matmul %102, %103, %cst_49 {dimension_numbers = #tpu.dot_dimension_numbers<[1], [1], [0], [0], [0, 0, 1, 0], [], []>, precision = #tpu.contract_precision<fp32>} : vector<16x8xf32>, vector<16x8xf32>, vector<16x16xf32> -> vector<16x16xf32>
    %cst_50 = arith.constant 0.353553385 : f32
    %105 = vector.broadcast %cst_50 : f32 to vector<16x16xf32>
    %106 = arith.mulf %104, %105 : vector<16x16xf32>
    %107 = arith.addf %106, %40 : vector<16x16xf32>
    %cst_51 = arith.constant dense<0xFF800000> : vector<16xf32>
    %108 = vector.multi_reduction <maximumf>, %107, %cst_51 [1] : vector<16x16xf32> to vector<16xf32>
    %109 = vector.shape_cast %108 : vector<16xf32> to vector<16x1xf32>
    %110 = vector.broadcast %109 : vector<16x1xf32> to vector<16x16xf32>
    %111 = arith.subf %107, %110 : vector<16x16xf32>
    %112 = math.exp %111 : vector<16x16xf32>
    %cst_52 = arith.constant dense<0.000000e+00> : vector<16xf32>
    %113 = vector.multi_reduction <add>, %112, %cst_52 [1] : vector<16x16xf32> to vector<16xf32>
    %114 = vector.shape_cast %113 : vector<16xf32> to vector<16x1xf32>
    %115 = vector.broadcast %114 : vector<16x1xf32> to vector<16x16xf32>
    %116 = arith.divf %112, %115 : vector<16x16xf32>
    %117 = vector.extract_strided_slice %39 {offsets = [0, 24], sizes = [16, 8], strides = [1, 1]} : vector<16x32xf32> to vector<16x8xf32>
    %cst_53 = arith.constant dense<0.000000e+00> : vector<16x8xf32>
    %118 = tpu.matmul %116, %117, %cst_53 {dimension_numbers = #tpu.dot_dimension_numbers<[1], [0], [0], [1], [0, 0, 1, 1], [], []>, precision = #tpu.contract_precision<fp32>} : vector<16x16xf32>, vector<16x8xf32>, vector<16x8xf32> -> vector<16x8xf32>
    %c24 = arith.constant 24 : index
    %c0_54 = arith.constant 0 : index
    %119 = vector.load %arg10[%c24, %c0_54] : memref<32x32xf32, #tpu.memory_space<vmem>>, vector<8x32xf32>
    %cst_55 = arith.constant dense<0.000000e+00> : vector<16x32xf32>
    %120 = tpu.matmul %118, %119, %cst_55 {dimension_numbers = #tpu.dot_dimension_numbers<[1], [0], [0], [1], [0, 0, 1, 1], [], []>, precision = #tpu.contract_precision<fp32>} : vector<16x8xf32>, vector<8x32xf32>, vector<16x32xf32> -> vector<16x32xf32>
    %121 = arith.addf %101, %120 : vector<16x32xf32>
    %c0_56 = arith.constant 0 : index
    %c0_57 = arith.constant 0 : index
    %122 = vector.load %arg11[%c0_56, %c0_57] : memref<1x32xf32, #tpu.memory_space<vmem>>, vector<1x32xf32>
    %123 = vector.broadcast %122 : vector<1x32xf32> to vector<16x32xf32>
    %124 = arith.addf %121, %123 : vector<16x32xf32>
    %125 = arith.addf %0, %124 : vector<16x32xf32>
    %c0_58 = arith.constant 0 : index
    %c0_59 = arith.constant 0 : index
    %126 = vector.load %arg12[%c0_58, %c0_59] : memref<1x32xf32, #tpu.memory_space<vmem>>, vector<1x32xf32>
    %c0_60 = arith.constant 0 : index
    %c0_61 = arith.constant 0 : index
    %127 = vector.load %arg13[%c0_60, %c0_61] : memref<1x32xf32, #tpu.memory_space<vmem>>, vector<1x32xf32>
    %cst_62 = arith.constant dense<0.000000e+00> : vector<16xf32>
    %128 = vector.multi_reduction <add>, %125, %cst_62 [1] : vector<16x32xf32> to vector<16xf32>
    %129 = vector.shape_cast %128 : vector<16xf32> to vector<16x1xf32>
    %cst_63 = arith.constant 3.200000e+01 : f32
    %130 = vector.broadcast %cst_63 : f32 to vector<16x1xf32>
    %131 = arith.divf %129, %130 : vector<16x1xf32>
    %132 = vector.broadcast %131 : vector<16x1xf32> to vector<16x32xf32>
    %133 = arith.subf %125, %132 : vector<16x32xf32>
    %134 = arith.mulf %133, %133 : vector<16x32xf32>
    %cst_64 = arith.constant dense<0.000000e+00> : vector<16xf32>
    %135 = vector.multi_reduction <add>, %134, %cst_64 [1] : vector<16x32xf32> to vector<16xf32>
    %136 = vector.shape_cast %135 : vector<16xf32> to vector<16x1xf32>
    %cst_65 = arith.constant 3.200000e+01 : f32
    %137 = vector.broadcast %cst_65 : f32 to vector<16x1xf32>
    %138 = arith.divf %136, %137 : vector<16x1xf32>
    %139 = vector.broadcast %131 : vector<16x1xf32> to vector<16x32xf32>
    %140 = arith.subf %125, %139 : vector<16x32xf32>
    %cst_66 = arith.constant 9.99999974E-6 : f32
    %141 = vector.broadcast %cst_66 : f32 to vector<16x1xf32>
    %142 = arith.addf %138, %141 : vector<16x1xf32>
    %143 = math.rsqrt %142 : vector<16x1xf32>
    %144 = vector.broadcast %143 : vector<16x1xf32> to vector<16x32xf32>
    %145 = arith.mulf %140, %144 : vector<16x32xf32>
    %146 = vector.broadcast %126 : vector<1x32xf32> to vector<16x32xf32>
    %147 = arith.mulf %145, %146 : vector<16x32xf32>
    %148 = vector.broadcast %127 : vector<1x32xf32> to vector<16x32xf32>
    %149 = arith.addf %147, %148 : vector<16x32xf32>
    %c0_67 = arith.constant 0 : index
    %c0_68 = arith.constant 0 : index
    %150 = vector.load %arg14[%c0_67, %c0_68] : memref<32x128xf32, #tpu.memory_space<vmem>>, vector<32x128xf32>
    %cst_69 = arith.constant dense<0.000000e+00> : vector<16x128xf32>
    %151 = tpu.matmul %149, %150, %cst_69 {dimension_numbers = #tpu.dot_dimension_numbers<[1], [0], [0], [1], [0, 0, 1, 1], [], []>, precision = #tpu.contract_precision<fp32>} : vector<16x32xf32>, vector<32x128xf32>, vector<16x128xf32> -> vector<16x128xf32>
    %c0_70 = arith.constant 0 : index
    %c0_71 = arith.constant 0 : index
    %152 = vector.load %arg15[%c0_70, %c0_71] : memref<1x128xf32, #tpu.memory_space<vmem>>, vector<1x128xf32>
    %153 = vector.broadcast %152 : vector<1x128xf32> to vector<16x128xf32>
    %154 = arith.addf %151, %153 : vector<16x128xf32>
    %cst_72 = arith.constant 5.000000e-01 : f32
    %155 = vector.broadcast %cst_72 : f32 to vector<16x128xf32>
    %156 = arith.mulf %155, %154 : vector<16x128xf32>
    %cst_73 = arith.constant 0.707106769 : f32
    %157 = vector.broadcast %cst_73 : f32 to vector<16x128xf32>
    %158 = arith.mulf %154, %157 : vector<16x128xf32>
    %159 = math.absf %158 : vector<16x128xf32>
    %cst_74 = arith.constant 0.327591091 : f32
    %160 = vector.broadcast %cst_74 : f32 to vector<16x128xf32>
    %161 = arith.mulf %160, %159 : vector<16x128xf32>
    %cst_75 = arith.constant 1.000000e+00 : f32
    %162 = vector.broadcast %cst_75 : f32 to vector<16x128xf32>
    %163 = arith.addf %162, %161 : vector<16x128xf32>
    %cst_76 = arith.constant 1.000000e+00 : f32
    %164 = vector.broadcast %cst_76 : f32 to vector<16x128xf32>
    %165 = arith.divf %164, %163 : vector<16x128xf32>
    %cst_77 = arith.constant 1.06140542 : f32
    %166 = vector.broadcast %cst_77 : f32 to vector<16x128xf32>
    %167 = arith.mulf %166, %165 : vector<16x128xf32>
    %cst_78 = arith.constant -1.45315206 : f32
    %168 = vector.broadcast %cst_78 : f32 to vector<16x128xf32>
    %169 = arith.addf %167, %168 : vector<16x128xf32>
    %170 = arith.mulf %169, %165 : vector<16x128xf32>
    %cst_79 = arith.constant 1.42141378 : f32
    %171 = vector.broadcast %cst_79 : f32 to vector<16x128xf32>
    %172 = arith.addf %170, %171 : vector<16x128xf32>
    %173 = arith.mulf %172, %165 : vector<16x128xf32>
    %cst_80 = arith.constant -0.284496725 : f32
    %174 = vector.broadcast %cst_80 : f32 to vector<16x128xf32>
    %175 = arith.addf %173, %174 : vector<16x128xf32>
    %176 = arith.mulf %175, %165 : vector<16x128xf32>
    %cst_81 = arith.constant 0.254829586 : f32
    %177 = vector.broadcast %cst_81 : f32 to vector<16x128xf32>
    %178 = arith.addf %176, %177 : vector<16x128xf32>
    %179 = arith.mulf %178, %165 : vector<16x128xf32>
    %cst_82 = arith.constant 0.000000e+00 : f32
    %180 = vector.broadcast %cst_82 : f32 to vector<16x128xf32>
    %181 = arith.subf %180, %159 : vector<16x128xf32>
    %182 = arith.mulf %181, %159 : vector<16x128xf32>
    %183 = math.exp %182 : vector<16x128xf32>
    %184 = arith.mulf %179, %183 : vector<16x128xf32>
    %cst_83 = arith.constant 1.000000e+00 : f32
    %185 = vector.broadcast %cst_83 : f32 to vector<16x128xf32>
    %186 = arith.subf %185, %184 : vector<16x128xf32>
    %cst_84 = arith.constant 0.000000e+00 : f32
    %187 = vector.broadcast %cst_84 : f32 to vector<16x128xf32>
    %188 = arith.cmpf oge, %158, %187 : vector<16x128xf32>
    %cst_85 = arith.constant 0.000000e+00 : f32
    %189 = vector.broadcast %cst_85 : f32 to vector<16x128xf32>
    %190 = arith.subf %189, %186 : vector<16x128xf32>
    %191 = arith.select %188, %186, %190 : vector<16x128xi1>, vector<16x128xf32>
    %cst_86 = arith.constant 1.000000e+00 : f32
    %192 = vector.broadcast %cst_86 : f32 to vector<16x128xf32>
    %193 = arith.addf %192, %191 : vector<16x128xf32>
    %194 = arith.mulf %156, %193 : vector<16x128xf32>
    %c0_87 = arith.constant 0 : index
    %c0_88 = arith.constant 0 : index
    %195 = vector.load %arg16[%c0_87, %c0_88] : memref<128x32xf32, #tpu.memory_space<vmem>>, vector<128x32xf32>
    %cst_89 = arith.constant dense<0.000000e+00> : vector<16x32xf32>
    %196 = tpu.matmul %194, %195, %cst_89 {dimension_numbers = #tpu.dot_dimension_numbers<[1], [0], [0], [1], [0, 0, 1, 1], [], []>, precision = #tpu.contract_precision<fp32>} : vector<16x128xf32>, vector<128x32xf32>, vector<16x32xf32> -> vector<16x32xf32>
    %c0_90 = arith.constant 0 : index
    %c0_91 = arith.constant 0 : index
    %197 = vector.load %arg17[%c0_90, %c0_91] : memref<1x32xf32, #tpu.memory_space<vmem>>, vector<1x32xf32>
    %198 = vector.broadcast %197 : vector<1x32xf32> to vector<16x32xf32>
    %199 = arith.addf %196, %198 : vector<16x32xf32>
    %200 = arith.addf %125, %199 : vector<16x32xf32>
    %c0_92 = arith.constant 0 : index
    %c0_93 = arith.constant 0 : index
    %201 = vector.load %arg18[%c0_92, %c0_93] : memref<16x32xf32, #tpu.memory_space<vmem>>, vector<16x32xf32>
    tpu.vector_store %arg18[%c0_92, %c0_93], %200 {strides = array<i32>} : memref<16x32xf32, #tpu.memory_space<vmem>>, vector<16x32xf32>,
    return
  }
}

</mosaic_0001>

<bundles_post_ra>
// kernel: encoder_layer.1
= control target key start
LH: loop header
LB: loop body
LE: loop exit
PB: predicated region body
PF: predicated region fallthrough
CT: control target
= control target key end

     0   :  { %s12776_s0 = inlined_call_operand.hbm [shape: f32[16,32], index: 0, kind: input, shape index: {}]   ;;  %s12777_s1 = inlined_call_operand.hbm [shape: f32[16,16], index: 1, kind: input, shape index: {}]   ;;  %s12778_s2 = inlined_call_operand.vmem [shape: f32[1,32], index: 2, kind: input, shape index: {}]   ;;  %s12779_s3 = inlined_call_operand.vmem [shape: f32[1,32], index: 3, kind: input, shape index: {}]   ;;  %s12780_s4 = inlined_call_operand.vmem [shape: f32[32,32], index: 4, kind: input, shape index: {}]   ;;  %s12781_s5 = inlined_call_operand.vmem [shape: f32[1,32], index: 5, kind: input, shape index: {}]   ;;  %s12782_s6 = inlined_call_operand.vmem [shape: f32[32,32], index: 6, kind: input, shape index: {}]   ;;  %s12783_s7 = inlined_call_operand.vmem [shape: f32[1,32], index: 7, kind: input, shape index: {}]   ;;  %s12784_s8 = inlined_call_operand.vmem [shape: f32[32,32], index: 8, kind: input, shape index: {}]   ;;  %s12785_s9 = inlined_call_operand.vmem [shape: f32[1,32], index: 9, kind: input, shape index: {}]   ;;  %s12786_s10 = inlined_call_operand.vmem [shape: f32[32,32], index: 10, kind: input, shape index: {}]   ;;  %s12787_s11 = inlined_call_operand.vmem [shape: f32[1,32], index: 11, kind: input, shape index: {}]   ;;  %s12788_s12 = inlined_call_operand.vmem [shape: f32[1,32], index: 12, kind: input, shape index: {}]   ;;  %s12789_s13 = inlined_call_operand.vmem [shape: f32[1,32], index: 13, kind: input, shape index: {}]   ;;  %s12790_s14 = inlined_call_operand.vmem [shape: f32[32,128], index: 14, kind: input, shape index: {}]   ;;  %s12791_s15 = inlined_call_operand.vmem [shape: f32[1,128], index: 15, kind: input, shape index: {}]   ;;  %s12792_s16 = inlined_call_operand.vmem [shape: f32[128,32], index: 16, kind: input, shape index: {}]   ;;  %s12793_s17 = inlined_call_operand.vmem [shape: f32[1,32], index: 17, kind: input, shape index: {}]   ;;  %s12794_s18 = inlined_call_operand.hbm [shape: f32[16,32], index: 18, kind: output, shape index: {}]  }
   0x1   :  { %12798 = sst [smem:[#allocation11_spill]] %s12776_s0 }
   0x2   :  { %12799 = sst [smem:[#allocation12_spill]] %s12777_s1 }
   0x3   :  { %12800 = sst [smem:[#allocation13_spill]] %s12778_s2 }
   0x4   :  { %12801 = sst [smem:[#allocation14_spill]] %s12793_s17 }
   0x5   :  { %12802 = sst [smem:[#allocation15_spill]] %s12794_s18 }
   0x6   :  { %23 = vsyncpa [#allocation3], 0 }
   0x7   :  { %24 = vsyncpa [#allocation6], 0 }
   0x8   :  { %25 = vsyncpa [#allocation4], 0  ;;  %s11706_s27 = smov [#allocation2]   ;;  %s12803_s0 = sld [smem:[#allocation11_spill]] }
   0x9   :  { %s31_s28 = sshll.u32 %s11706_s27, 4  ;;  %s32_s28 = int_to_ptr.vmem [resolvable:$true] %s31_s28 }
   0xe   :  { %s11634_s19 = scalar_lea.hbm %s12803_s0, 256 }
   0xf   :  { %p11635_p0 = scmp.ne.s32.totalorder %s12803_s0, %s11634_s19  ;;  %p11638_p1 = scmp.lt.u32.totalorder %s11634_s19, %s12803_s0 }
  0x11   :  { %p11640_p2 = pnand %p11638_p1, %p11635_p0 }
  0x13   :  { %11643 = shalt.err (!%p11640_p2)
}
  0x14   :  { %s11644_s2 = scalar_lea.vmem %s32_s28, 256  ;;  %p11649_p4 = scmp.lt.s32.totalorder %s32_s28, %s32_s28 }
  0x15   :  { %p11645_p3 = scmp.ne.s32.totalorder %s32_s28, %s11644_s2  ;;  %p11650_p5 = scmp.lt.s32.totalorder %s11644_s2, %s11644_s2 }
  0x17   :  { %p11651_p6 = por %p11650_p5, %p11649_p4 }
  0x19   :  { %p11652_p7 = pnand %p11651_p6, %p11645_p3 }
  0x1b   :  { %11655 = shalt.err (!%p11652_p7)
}
  0x1c   :  { %s11707_s23 = smov 128   ;;  %s11708_s24 = smov 8  }
  0x1d   :  { %37 = dma.hbm_to_vmem [thread:$0]  %s12803_s0, 256, %s32_s28, [#allocation3], %s11707_s23, %s11707_s23, %s11708_s24  }
  0x1e   :  { %s11709_s27 = smov [#allocation5]   ;;  %s12804_s1 = sld [smem:[#allocation12_spill]] }
  0x1f   :  { %s43_s29 = sshll.u32 %s11709_s27, 4  ;;  %s44_s29 = int_to_ptr.vmem [resolvable:$true] %s43_s29 }
  0x24   :  { %s11656_s20 = scalar_lea.hbm %s12804_s1, 256 }
  0x25   :  { %p11657_p8 = scmp.ne.s32.totalorder %s12804_s1, %s11656_s20  ;;  %p11660_p9 = scmp.lt.u32.totalorder %s11656_s20, %s12804_s1 }
  0x27   :  { %p11662_p10 = pnand %p11660_p9, %p11657_p8 }
  0x29   :  { %11665 = shalt.err (!%p11662_p10)
}
  0x2a   :  { %s11666_s17 = scalar_lea.vmem %s44_s29, 256  ;;  %p11671_p12 = scmp.lt.s32.totalorder %s44_s29, %s44_s29 }
  0x2b   :  { %p11667_p11 = scmp.ne.s32.totalorder %s44_s29, %s11666_s17  ;;  %p11672_p13 = scmp.lt.s32.totalorder %s11666_s17, %s11666_s17 }
  0x2d   :  { %p11673_p0 = por %p11672_p13, %p11671_p12 }
  0x2f   :  { %p11674_p1 = pnand %p11673_p0, %p11667_p11 }
  0x31   :  { %11677 = shalt.err (!%p11674_p1)
}
  0x32   :  { %49 = dma.hbm_to_vmem [thread:$0]  %s12804_s1, 256, %s44_s29, [#allocation6], %s11707_s23, %s11707_s23, %s11708_s24  }
  0x33   :  { %11700 = dma.done.wait [#allocation3], 256  }
  0x34   :  { %11701 = vsyncadd [#allocation3], 4294967040 }
  0x35   :  { %11702 = dma.done.wait [#allocation6], 256  }
  0x36   :  { %11703 = vsyncadd [#allocation6], 4294967040  ;;  %vm92_vm0 = vcmask 261120   ;;  %v88_v0 = vld [vmem:[#allocation2] sm:$0xff]  ;;  %v89_v1 = vld [vmem:[#allocation2 + $0x8] sm:$0xff]  ;;  %s12805_s18 = sld [smem:[#allocation13_spill]] }
  0x37   :  { %v93_v2 = vsel %vm92_vm0, %v88_v0, 0.0  ;;  %v96_v3 = vsel %vm92_vm0, %v89_v1, 0.0  ;;  %v136_v14 = vld [vmem:[%s12780_s4] sm:$0xff]  ;;  %v137_v15 = vld [vmem:[%s12780_s4 + $0x8] sm:$0xff]  ;;  %v138_v20 = vld [vmem:[%s12780_s4 + $0x10] sm:$0xff]  ;;  %vm1761_vm1 = vcmask 64512  }
  0x38   :  { %94 = vadd.xlane.f32.xlu0 %v93_v2  ;;  %v154_v16 = vand.u32 4294901760, %v136_v14  ;;  %v157_v17 = vand.u32 4294901760, %v137_v15  ;;  %v681_v18 = vld [vmem:[%s12782_s6] sm:$0xff]  ;;  %v682_v19 = vld [vmem:[%s12782_s6 + $0x8] sm:$0xff]  ;;  %v139_v23 = vld [vmem:[%s12780_s4 + $0x18] sm:$0xff]  ;;  %v160_v24 = vand.u32 4294901760, %v138_v20 }
  0x39   :  { %v693_v21 = vand.u32 4294901760, %v681_v18  ;;  %v696_v22 = vand.u32 4294901760, %v682_v19  ;;  %v163_v26 = vand.u32 4294901760, %v139_v23  ;;  %v683_v31 = vld [vmem:[%s12782_s6 + $0x10] sm:$0xff]  ;;  %v684_v32 = vld [vmem:[%s12782_s6 + $0x18] sm:$0xff]  ;;  %vm2280_vm2 = vcmask 130048  }
  0x3a   :  { %v11869_v25 = vpack.c.bf16 %v157_v17, %v154_v16  ;;  %v244_v27 = vsub.f32 %v136_v14, %v154_v16  ;;  %v251_v28 = vsub.f32 %v137_v15, %v157_v17  ;;  %v699_v36 = vand.u32 4294901760, %v683_v31  ;;  %s11712_s17 = smov 104   ;;  %s11713_s25 = smov [#allocation7]  }
  0x3b   :  { %v11871_v29 = vpack.c.bf16 %v696_v22, %v693_v21  ;;  %v11874_v30 = vpack.c.bf16 %v163_v26, %v160_v24  ;;  %v783_v35 = vsub.f32 %v681_v18, %v693_v21  ;;  %v702_v37 = vand.u32 4294901760, %v684_v32  ;;  %s9345_s26 = sshll.u32 %s11713_s25, 4  ;;  %s9346_s26 = int_to_ptr.vmem [resolvable:$true] %s9345_s26 }
  0x3c   :  { %97 = vadd.xlane.f32.xlu0 %v96_v3  ;;  %10815 = vmatprep.subr.bf16.mxu0 %v11869_v25  ;;  %v245_v33 = vand.u32 4294901760, %v244_v27  ;;  %v252_v34 = vand.u32 4294901760, %v251_v28  ;;  %v790_v38 = vsub.f32 %v682_v19, %v696_v22  ;;  %v258_v44 = vsub.f32 %v138_v20, %v160_v24  ;;  %p11683_p3 = scmp.lt.s32.totalorder %s9346_s26, %s9346_s26 }
  0x3d   :  { %10817 = vmatpush3.bf16.msra.mxu0 %v11869_v25  ;;  %10863 = vmatprep.subr.bf16.mxu1 %v11871_v29  ;;  %v784_v41 = vand.u32 4294901760, %v783_v35  ;;  %v11886_v42 = vpack.c.bf16 %v702_v37, %v699_v36  ;;  %v265_v45 = vsub.f32 %v139_v23, %v163_v26  ;;  %v797_v49 = vsub.f32 %v683_v31, %v699_v36  ;;  %v9358_v23 = vld [vmem:[%s12805_s18] ss:$0 sm:$0xff]  ;;  %s12806_s18 = sld [smem:[#allocation14_spill]] }
  0x3e   :  { %10865 = vmatpush3.bf16.msra.mxu1 %v11871_v29  ;;  %10819 = vmatprep.subr.bf16.mxu0 %v11874_v30  ;;  %v246_v39 = vsub.f32 %v244_v27, %v245_v33  ;;  %v253_v40 = vsub.f32 %v251_v28, %v252_v34  ;;  %v791_v43 = vand.u32 4294901760, %v790_v38  ;;  %v259_v51 = vand.u32 4294901760, %v258_v44  ;;  %v9359_v26 = vld [vmem:[%s12779_s3] ss:$0 sm:$0xff]  ;;  %s11678_s3 = scalar_lea.vmem %s9346_s26, 256 }
  0x3f   :  { %v785_v48 = vsub.f32 %v783_v35, %v784_v41  ;;  %10867 = vmatprep.subr.bf16.mxu1 %v11886_v42  ;;  %v266_v52 = vand.u32 4294901760, %v265_v45  ;;  %v804_v53 = vsub.f32 %v684_v32, %v702_v37  ;;  %v798_v56 = vand.u32 4294901760, %v797_v49  ;;  %p11679_p2 = scmp.ne.s32.totalorder %s9346_s26, %s11678_s3  ;;  %p11684_p4 = scmp.lt.s32.totalorder %s11678_s3, %s11678_s3 }
  0x40   :  { %v247_v46 = vand.u32 4294901760, %v246_v39  ;;  %v254_v47 = vand.u32 4294901760, %v253_v40  ;;  %v792_v50 = vsub.f32 %v790_v38, %v791_v43  ;;  %v260_v58 = vsub.f32 %v258_v44, %v259_v51 }
  0x41   :  { %10821 = vmatpush3.bf16.msra.mxu0 %v11874_v30  ;;  %v786_v55 = vand.u32 4294901760, %v785_v48  ;;  %v267_v59 = vsub.f32 %v265_v45, %v266_v52  ;;  %v805_v60 = vand.u32 4294901760, %v804_v53  ;;  %v799_v61 = vsub.f32 %v797_v49, %v798_v56  ;;  %p11685_p5 = por %p11684_p4, %p11683_p3 }
  0x42   :  { %10869 = vmatpush3.bf16.msra.mxu1 %v11886_v42  ;;  %v10822_v54 = vpack.c.bf16 %v254_v47, %v247_v46  ;;  %v793_v57 = vand.u32 4294901760, %v792_v50  ;;  %v261_v63 = vand.u32 4294901760, %v260_v58  ;;  %v11895_v14 = vpack.c.bf16 %v266_v52, %v259_v51  ;;  %v1220_v46 = vld [vmem:[%s12784_s8] sm:$0xff]  ;;  %v1221_v47 = vld [vmem:[%s12784_s8 + $0x8] sm:$0xff]  ;;  %v1222_v50 = vld [vmem:[%s12784_s8 + $0x10] sm:$0xff] }
  0x43   :  { %v800_v2 = vand.u32 4294901760, %v799_v61  ;;  %v11897_v15 = vpack.c.bf16 %v805_v60, %v798_v56  ;;  %v1232_v48 = vand.u32 4294901760, %v1220_v46  ;;  %v1223_v51 = vld [vmem:[%s12784_s8 + $0x18] sm:$0xff]  ;;  %v1238_v52 = vand.u32 4294901760, %v1222_v50  ;;  %p11686_p6 = pnand %p11685_p5, %p11679_p2 }
  0x44   :  { %10823 = vmatprep.subr.bf16.mxu0 %v10822_v54  ;;  %v10870_v62 = vpack.c.bf16 %v793_v57, %v786_v55 }
  0x45   :  { %v1336_v58 = vsub.f32 %v1222_v50, %v1238_v52 }
  0x46   :  { %10871 = vmatprep.subr.bf16.mxu1 %v10870_v62 }
  0xc5   :  { %v95_v4 = vpop.xlane.xlu0 %94 }
  0xc6   :  { %v100_v5 = vmul.f32 0.03125, %v95_v4 }
  0xc8   :  { %v11841_v6 = vsub.f32 %v88_v0, %v100_v5  ;;  %v268_v0 = vand.u32 4294901760, %v267_v59 }
  0xc9   :  { %v98_v7 = vpop.xlane.xlu0 %97 }
  0xca   :  { %v101_v8 = vmul.f32 0.03125, %v98_v7  ;;  %v104_v9 = vmul.f32 %v11841_v6, %v11841_v6  ;;  %v10826_v3 = vpack.c.bf16 %v268_v0, %v261_v63  ;;  %v10830_v7 = vpack.c.bf16 %v251_v28, %v244_v27 }
  0xcb   :  { %v1337_v63 = vand.u32 4294901760, %v1336_v58 }
  0xcc   :  { %v11845_v10 = vsub.f32 %v89_v1, %v101_v8  ;;  %v106_v11 = vsel %vm92_vm0, %v104_v9, 0.0  ;;  %v806_v1 = vsub.f32 %v804_v53, %v805_v60  ;;  %v10878_v8 = vpack.c.bf16 %v790_v38, %v783_v35 }
  0xcd   :  { %107 = vadd.xlane.f32.xlu1 %v106_v11  ;;  %v10834_v9 = vpack.c.bf16 %v265_v45, %v258_v44  ;;  %v10882_v11 = vpack.c.bf16 %v804_v53, %v797_v49  ;;  %v1235_v49 = vand.u32 4294901760, %v1221_v47  ;;  %v1241_v53 = vand.u32 4294901760, %v1223_v51 }
  0xce   :  { %v105_v12 = vmul.f32 %v11845_v10, %v11845_v10  ;;  %v807_v4 = vand.u32 4294901760, %v806_v1 }
  0xcf   :  { %v11976_v55 = vsub.f32 %v1221_v47, %v1235_v49  ;;  %v1343_v59 = vsub.f32 %v1223_v51, %v1241_v53  ;;  %v10910_v60 = vpack.c.bf16 %v1235_v49, %v1232_v48 }
  0xd0   :  { %v109_v13 = vsel %vm92_vm0, %v105_v12, 0.0  ;;  %v10874_v5 = vpack.c.bf16 %v807_v4, %v800_v2  ;;  %v11891_v12 = vpack.c.bf16 %v252_v34, %v245_v33  ;;  %v1338_v2 = vsub.f32 %v1336_v58, %v1337_v63 }
  0xd1   :  { %110 = vadd.xlane.f32.xlu1 %v109_v13  ;;  %v11893_v13 = vpack.c.bf16 %v791_v43, %v784_v41  ;;  %v1330_v57 = vand.u32 4294901760, %v11976_v55  ;;  %v1344_v0 = vand.u32 4294901760, %v1343_v59 }
 0x15a   :  { %v108_v16 = vpop.xlane.xlu1 %107 }
 0x15b   :  { %v112_v17 = vmul.f32 0.03125, %v108_v16 }
 0x15d   :  { %v114_v18 = vadd.f32 1e-05, %v112_v17 }
 0x15e   :  { %v111_v19 = vpop.xlane.xlu1 %110 }
 0x15f   :  { %11584 = vrsqrt.f32 %v114_v18  ;;  %v113_v20 = vmul.f32 0.03125, %v111_v19 }
 0x161   :  { %v115_v21 = vadd.f32 1e-05, %v113_v20 }
 0x163   :  { %11586 = vrsqrt.f32 %v115_v21 }
 0x169   :  { %v11585_v22 = vpop.eup %11584 }
 0x16a   :  { %v118_v24 = vmul.f32 %v11585_v22, %v11841_v6 }
 0x16c   :  { %v126_v27 = vmul.f32 %v9358_v23, %v118_v24 }
 0x16d   :  { %v11587_v28 = vpop.eup %11586 }
 0x16e   :  { %v134_v31 = vadd.f32 %v9359_v26, %v126_v27  ;;  %v119_v32 = vmul.f32 %v11587_v28, %v11845_v10 }
 0x170   :  { %v127_v33 = vmul.f32 %v9358_v23, %v119_v32  ;;  %v148_v34 = vsel %vm92_vm0, %v134_v31, 0 }
 0x171   :  { %v11908_v35 = vand.u32 4294901760, %v148_v34 }
 0x172   :  { %v135_v36 = vadd.f32 %v9359_v26, %v127_v33 }
 0x173   :  { %v11911_v37 = vsub.f32 %v148_v34, %v11908_v35 }
 0x174   :  { %v151_v6 = vsel %vm92_vm0, %v135_v36, 0 }
 0x175   :  { %v11915_v38 = vand.u32 4294901760, %v11911_v37  ;;  %v11917_v39 = vand.u32 4294901760, %v151_v6 }
 0x177   :  { %v225_v40 = vsub.f32 %v11911_v37, %v11915_v38  ;;  %v11922_v10 = vsub.f32 %v151_v6, %v11917_v39 }
 0x179   :  { %v11924_v41 = vand.u32 4294901760, %v225_v40  ;;  %v11927_v43 = vand.u32 4294901760, %v11922_v10 }
 0x17b   :  { %9892 = vmatprep.mubr.f32.mxu0 %v11924_v41  ;;  %9958 = vmatprep.mubr.f32.mxu1 %v11924_v41  ;;  %v235_v44 = vsub.f32 %v11922_v10, %v11927_v43 }
 0x17d   :  { %v11933_v45 = vand.u32 4294901760, %v235_v44 }
 0x17f   :  { %9893 = vmatmul.mubr.f32.vlgmr.msra.gmra.mrb[0].mxu0 %v11933_v45  ;;  %9959 = vmatmul.mubr.f32.vlgmr.msra.gmra.mrb[0].mxu1 %v11933_v45 }
 0x180   :  { %10825 = vmatpush3.bf16.msra.mxu0 %v10822_v54  ;;  %9903 = vmatprep.mubr.f32.mxu0 %v11908_v35  ;;  %v11974_v54 = vsub.f32 %v1220_v46, %v1232_v48 }
 0x181   :  { %10873 = vmatpush3.bf16.msra.mxu1 %v10870_v62  ;;  %9969 = vmatprep.mubr.f32.mxu1 %v11908_v35  ;;  %v1331_v62 = vsub.f32 %v11976_v55, %v1330_v57 }
 0x182   :  { %10827 = vmatprep.subr.bf16.mxu0 %v10826_v3  ;;  %10875 = vmatprep.subr.bf16.mxu1 %v10874_v5  ;;  %v1323_v56 = vand.u32 4294901760, %v11974_v54 }
 0x184   :  { %10829 = vmatpush3.bf16.msra.mxu0 %v10826_v3  ;;  %v1324_v61 = vsub.f32 %v11974_v54, %v1323_v56  ;;  %v1345_v3 = vsub.f32 %v1343_v59, %v1344_v0 }
 0x185   :  { %10877 = vmatpush3.bf16.msra.mxu1 %v10874_v5  ;;  %10831 = vmatprep.subr.bf16.mxu0 %v10830_v7  ;;  %v1339_v5 = vand.u32 4294901760, %v1338_v2 }
 0x186   :  { %10879 = vmatprep.subr.bf16.mxu1 %v10878_v8  ;;  %v1325_v1 = vand.u32 4294901760, %v1324_v61 }
 0x187   :  { %9904 = vmatmul.mubr.f32.vlgmr.msra.gmra.mrb[0].mxu0 %v11917_v39 }
 0x188   :  { %10833 = vmatpush3.bf16.msra.mxu0 %v10830_v7  ;;  %9970 = vmatmul.mubr.f32.vlgmr.msra.gmra.mrb[0].mxu1 %v11917_v39  ;;  %v1346_v7 = vand.u32 4294901760, %v1345_v3 }
 0x189   :  { %9914 = vmatprep.mubr.f32.mxu0 %v11911_v37  ;;  %10881 = vmatpush3.bf16.msra.mxu1 %v10878_v8  ;;  %v10930_v8 = vpack.c.bf16 %v1343_v59, %v1336_v58 }
 0x18a   :  { %9980 = vmatprep.mubr.f32.mxu1 %v11911_v37  ;;  %10835 = vmatprep.subr.bf16.mxu0 %v10834_v9 }
 0x18b   :  { %10883 = vmatprep.subr.bf16.mxu1 %v10882_v11 }
 0x18c   :  { %10837 = vmatpush3.bf16.msra.mxu0 %v10834_v9  ;;  %v10942_v9 = vpack.c.bf16 %v1330_v57, %v1323_v56 }
 0x18d   :  { %10885 = vmatpush3.bf16.msra.mxu1 %v10882_v11  ;;  %10839 = vmatprep.subr.bf16.mxu0 %v11869_v25  ;;  %v10946_v11 = vpack.c.bf16 %v1344_v0, %v1337_v63 }
 0x18e   :  { %10887 = vmatprep.subr.bf16.mxu1 %v11871_v29 }
 0x18f   :  { %9915 = vmatmul.mubr.f32.vlgmr.msra.gmra.mrb[0].mxu0 %v11922_v10 }
 0x190   :  { %10841 = vmatpush3.bf16.msra.mxu0 %v11869_v25  ;;  %9981 = vmatmul.mubr.f32.vlgmr.msra.gmra.mrb[0].mxu1 %v11922_v10 }
 0x191   :  { %9925 = vmatprep.mubr.f32.mxu0 %v11915_v38  ;;  %10889 = vmatpush3.bf16.msra.mxu1 %v11871_v29 }
 0x192   :  { %9991 = vmatprep.mubr.f32.mxu1 %v11915_v38  ;;  %10843 = vmatprep.subr.bf16.mxu0 %v11874_v30 }
 0x193   :  { %10891 = vmatprep.subr.bf16.mxu1 %v11886_v42 }
 0x194   :  { %10845 = vmatpush3.bf16.msra.mxu0 %v11874_v30 }
 0x195   :  { %10893 = vmatpush3.bf16.msra.mxu1 %v11886_v42  ;;  %10847 = vmatprep.subr.bf16.mxu0 %v11891_v12 }
 0x196   :  { %10895 = vmatprep.subr.bf16.mxu1 %v11893_v13 }
 0x197   :  { %9926 = vmatmul.mubr.f32.vlgmr.msra.gmra.mrb[0].mxu0 %v11927_v43 }
 0x198   :  { %10849 = vmatpush3.bf16.msra.mxu0 %v11891_v12  ;;  %9992 = vmatmul.mubr.f32.vlgmr.msra.gmra.mrb[0].mxu1 %v11927_v43  ;;  %v9360_v12 = vld [vmem:[%s12781_s5] ss:$0 sm:$0xff]  ;;  %s11710_s5 = smov 120  }
 0x199   :  { %9936 = vmatprep.mubr.f32.mxu0 %v11908_v35  ;;  %10897 = vmatpush3.bf16.msra.mxu1 %v11893_v13  ;;  %v9361_v13 = vld [vmem:[%s12783_s7] ss:$0 sm:$0xff] }
 0x19a   :  { %10002 = vmatprep.mubr.f32.mxu1 %v11908_v35  ;;  %10851 = vmatprep.subr.bf16.mxu0 %v11895_v14 }
 0x19b   :  { %10899 = vmatprep.subr.bf16.mxu1 %v11897_v15 }
 0x19c   :  { %10853 = vmatpush3.bf16.msra.mxu0 %v11895_v14 }
 0x19d   :  { %10901 = vmatpush3.bf16.msra.mxu1 %v11897_v15  ;;  %10855 = vmatprep.subr.bf16.mxu0 %v11869_v25 }
 0x19e   :  { %10903 = vmatprep.subr.bf16.mxu1 %v11871_v29 }
 0x19f   :  { %9937 = vmatmul.mubr.f32.vlgmr.msra.gmra.mrb[0].mxu0 %v11917_v39 }
 0x1a0   :  { %10857 = vmatpush3.bf16.msra.mxu0 %v11869_v25  ;;  %10003 = vmatmul.mubr.f32.vlgmr.msra.gmra.mrb[0].mxu1 %v11917_v39  ;;  %v10914_v25 = vpack.c.bf16 %v1241_v53, %v1238_v52  ;;  %v9362_v52 = vld [vmem:[%s12785_s9] ss:$0 sm:$0xff]  ;;  %s11711_s9 = smov 112  }
 0x1a1   :  { %9947 = vmatprep.mubr.f32.mxu0 %v11908_v35  ;;  %10905 = vmatpush3.bf16.msra.mxu1 %v11871_v29  ;;  %v1332_v29 = vand.u32 4294901760, %v1331_v62 }
 0x1a2   :  { %10013 = vmatprep.mubr.f32.mxu1 %v11908_v35  ;;  %10859 = vmatprep.subr.bf16.mxu0 %v11874_v30 }
 0x1a3   :  { %10907 = vmatprep.subr.bf16.mxu1 %v11886_v42  ;;  %v10918_v4 = vpack.c.bf16 %v1332_v29, %v1325_v1 }
 0x1a4   :  { %10861 = vmatpush3.bf16.msra.mxu0 %v11874_v30  ;;  %v10922_v30 = vpack.c.bf16 %v1346_v7, %v1339_v5 }
 0x1a5   :  { %10909 = vmatpush3.bf16.msra.mxu1 %v11886_v42  ;;  %10911 = vmatprep.subr.bf16.mxu0 %v10910_v60  ;;  %v10926_v42 = vpack.c.bf16 %v11976_v55, %v11974_v54 }
 0x1a7   :  { %9948 = vmatmul.mubr.f32.vlgmr.msra.gmra.mrb[0].mxu0 %v11917_v39 }
 0x1a8   :  { %10014 = vmatmul.mubr.f32.vlgmr.msra.gmra.mrb[0].mxu1 %v11917_v39  ;;  %10913 = vmatpush3.bf16.msra.mxu0 %v10910_v60 }
 0x1a9   :  { %10024 = vmatprep.mubr.f32.mxu0 %v11924_v41  ;;  %10915 = vmatprep.subr.bf16.mxu0 %v10914_v25 }
 0x1ac   :  { %10917 = vmatpush3.bf16.msra.mxu0 %v10914_v25 }
 0x1ad   :  { %10919 = vmatprep.subr.bf16.mxu0 %v10918_v4 }
 0x1af   :  { %10025 = vmatmul.mubr.f32.vlgmr.msra.gmra.mrb[2].mxu0 %v11933_v45 }
 0x1b0   :  { %10921 = vmatpush3.bf16.msra.mxu0 %v10918_v4  ;;  %10035 = vmatprep.mubr.f32.mxu0 %v11908_v35 }
 0x1b1   :  { %10923 = vmatprep.subr.bf16.mxu0 %v10922_v30 }
 0x1b4   :  { %10925 = vmatpush3.bf16.msra.mxu0 %v10922_v30 }
 0x1b5   :  { %10927 = vmatprep.subr.bf16.mxu0 %v10926_v42 }
 0x1b7   :  { %10036 = vmatmul.mubr.f32.vlgmr.msra.gmra.mrb[2].mxu0 %v11917_v39 }
 0x1b8   :  { %10929 = vmatpush3.bf16.msra.mxu0 %v10926_v42  ;;  %10046 = vmatprep.mubr.f32.mxu0 %v11911_v37 }
 0x1b9   :  { %10931 = vmatprep.subr.bf16.mxu0 %v10930_v8 }
 0x1bc   :  { %10933 = vmatpush3.bf16.msra.mxu0 %v10930_v8 }
 0x1bd   :  { %10935 = vmatprep.subr.bf16.mxu0 %v10910_v60 }
 0x1bf   :  { %10047 = vmatmul.mubr.f32.vlgmr.msra.gmra.mrb[2].mxu0 %v11922_v10 }
 0x1c0   :  { %10937 = vmatpush3.bf16.msra.mxu0 %v10910_v60  ;;  %10057 = vmatprep.mubr.f32.mxu0 %v11915_v38 }
 0x1c1   :  { %10939 = vmatprep.subr.bf16.mxu0 %v10914_v25 }
 0x1c4   :  { %10941 = vmatpush3.bf16.msra.mxu0 %v10914_v25 }
 0x1c5   :  { %10943 = vmatprep.subr.bf16.mxu0 %v10942_v9 }
 0x1c7   :  { %10058 = vmatmul.mubr.f32.vlgmr.msra.gmra.mrb[2].mxu0 %v11927_v43 }
 0x1c8   :  { %10945 = vmatpush3.bf16.msra.mxu0 %v10942_v9  ;;  %10068 = vmatprep.mubr.f32.mxu0 %v11908_v35 }
 0x1c9   :  { %10947 = vmatprep.subr.bf16.mxu0 %v10946_v11 }
 0x1cc   :  { %10949 = vmatpush3.bf16.msra.mxu0 %v10946_v11 }
 0x1cd   :  { %10951 = vmatprep.subr.bf16.mxu0 %v10910_v60 }
 0x1cf   :  { %10069 = vmatmul.mubr.f32.vlgmr.msra.gmra.mrb[2].mxu0 %v11917_v39 }
 0x1d0   :  { %10953 = vmatpush3.bf16.msra.mxu0 %v10910_v60  ;;  %10079 = vmatprep.mubr.f32.mxu0 %v11908_v35 }
 0x1d1   :  { %10955 = vmatprep.subr.bf16.mxu0 %v10914_v25 }
 0x1d4   :  { %10957 = vmatpush3.bf16.msra.mxu0 %v10914_v25 }
 0x1d7   :  { %10080 = vmatmul.mubr.f32.vlgmr.msra.gmra.mrb[2].mxu0 %v11917_v39 }
 0x27a   :  { %v9949_v14 = vpop.f32.mrb[0].mxu0 }
 0x27b   :  { %v12021_v15 = vadd.f32 %v9949_v14, %v9360_v12  ;;  %v10015_v16 = vpop.f32.mrb[0].mxu1  ;;  %v671_v17 = vpop.f32.mrb[1].mxu0 }
 0x27c   :  { %v12023_v18 = vadd.f32 %v10015_v16, %v9361_v13  ;;  %v12025_v19 = vadd.f32 %v9360_v12, %v671_v17  ;;  %v1210_v20 = vpop.f32.mrb[1].mxu1 }
 0x27d   :  { %v1766_v21 = vsel %vm1761_vm1, %v12021_v15, 0  ;;  %v12029_v22 = vadd.f32 %v9361_v13, %v1210_v20 }
 0x27e   :  { %v12031_v23 = vand.u32 4294901760, %v1766_v21  ;;  %v1772_v24 = vsel %vm1761_vm1, %v12023_v18, 0  ;;  %v1763_v26 = vsel %vm1761_vm1, %v12025_v19, 0  ;;  %2818 = vrot.lane.b32.xlu1 %v12023_v18, %s11710_s5 }
 0x27f   :  { %v1778_v27 = vand.u32 4294901760, %v1772_v24  ;;  %v1841_v28 = vand.u32 4294901760, %v1763_v26  ;;  %v1769_v31 = vsel %vm1761_vm1, %v12029_v22, 0  ;;  %2816 = vrot.lane.b32.xlu0 %v12029_v22, %s11710_s5 }
 0x280   :  { %v1852_v32 = vsub.f32 %v1766_v21, %v12031_v23  ;;  %v1775_v33 = vand.u32 4294901760, %v1769_v31 }
 0x281   :  { %v1870_v34 = vsub.f32 %v1772_v24, %v1778_v27  ;;  %v1842_v35 = vsub.f32 %v1763_v26, %v1841_v28 }
 0x282   :  { %v10958_v36 = vpack.c.bf16 %v1778_v27, %v1775_v33  ;;  %v1863_v37 = vsub.f32 %v1769_v31, %v1775_v33  ;;  %2812 = vrot.lane.b32.xlu1 %v12025_v19, %s11710_s5  ;;  %v1853_v6 = vand.u32 4294901760, %v1852_v32 }
 0x283   :  { %v1843_v38 = vand.u32 4294901760, %v1842_v35  ;;  %v1871_v39 = vand.u32 4294901760, %v1870_v34 }
 0x284   :  { %10959 = vmatprep.subr.bf16.mxu1 %v10958_v36  ;;  %v1864_v40 = vand.u32 4294901760, %v1863_v37  ;;  %v1854_v43 = vsub.f32 %v1852_v32, %v1853_v6  ;;  %v10966_v50 = vpack.c.bf16 %v1870_v34, %v1863_v37 }
 0x285   :  { %10961 = vmatpush3.bf16.xpose.msra.mxu1 %v10958_v36  ;;  %v1844_v10 = vsub.f32 %v1842_v35, %v1843_v38  ;;  %v1872_v41 = vsub.f32 %v1870_v34, %v1871_v39 }
 0x286   :  { %2814 = vrot.lane.b32.xlu1 %v12021_v15, %s11710_s5  ;;  %v1865_v44 = vsub.f32 %v1863_v37, %v1864_v40  ;;  %v1855_v48 = vand.u32 4294901760, %v1854_v43  ;;  %v10974_v51 = vpack.c.bf16 %v1871_v39, %v1864_v40 }
 0x287   :  { %v1845_v45 = vand.u32 4294901760, %v1844_v10  ;;  %v1873_v46 = vand.u32 4294901760, %v1872_v41 }
 0x288   :  { %v1866_v47 = vand.u32 4294901760, %v1865_v44  ;;  %v12077_v44 = vld [vmem:[#allocation5 + $0x8] sm:$0xff] }
 0x289   :  { %10086 = vmatprep.mubr.f32.mxu1 %v1845_v45 }
 0x28a   :  { %v10962_v49 = vpack.c.bf16 %v1873_v46, %v1866_v47  ;;  %v12079_v47 = vld [vmem:[#allocation5] sm:$0xff] }
 0x28c   :  { %10087 = vmatmul.mubr.f32.vlgmr.msra.gmra.mrb[2].mxu1 %v1855_v48  ;;  %10963 = vmatprep.subr.bf16.mxu1 %v10962_v49 }
 0x28d   :  { %10965 = vmatpush3.bf16.xpose.msra.mxu1 %v10962_v49  ;;  %10093 = vmatprep.mubr.f32.mxu1 %v1841_v28 }
 0x28e   :  { %10967 = vmatprep.subr.bf16.mxu1 %v10966_v50 }
 0x294   :  { %10094 = vmatmul.mubr.f32.vlgmr.msra.gmra.mrb[2].mxu1 %v12031_v23 }
 0x295   :  { %10969 = vmatpush3.bf16.xpose.msra.mxu1 %v10966_v50  ;;  %10100 = vmatprep.mubr.f32.mxu1 %v1842_v35 }
 0x296   :  { %10971 = vmatprep.subr.bf16.mxu1 %v10958_v36 }
 0x29c   :  { %10101 = vmatmul.mubr.f32.vlgmr.msra.gmra.mrb[2].mxu1 %v1852_v32 }
 0x29d   :  { %10973 = vmatpush3.bf16.xpose.msra.mxu1 %v10958_v36  ;;  %10107 = vmatprep.mubr.f32.mxu1 %v1843_v38 }
 0x29e   :  { %10975 = vmatprep.subr.bf16.mxu1 %v10974_v51 }
 0x2a4   :  { %10108 = vmatmul.mubr.f32.vlgmr.msra.gmra.mrb[2].mxu1 %v1853_v6 }
 0x2a5   :  { %10977 = vmatpush3.bf16.xpose.msra.mxu1 %v10974_v51  ;;  %10114 = vmatprep.mubr.f32.mxu1 %v1841_v28 }
 0x2a6   :  { %10979 = vmatprep.subr.bf16.mxu1 %v10958_v36 }
 0x2aa   :  { %v10081_v53 = vpop.f32.mrb[2].mxu0 }
 0x2ab   :  { %v12052_v54 = vadd.f32 %v10081_v53, %v9362_v52  ;;  %v1749_v55 = vpop.f32.mrb[3].mxu0 }
 0x2ac   :  { %v12054_v56 = vadd.f32 %v9362_v52, %v1749_v55  ;;  %10115 = vmatmul.mubr.f32.vlgmr.msra.gmra.mrb[2].mxu1 %v12031_v23 }
 0x2ad   :  { %v2313_v57 = vand.u32 4294901760, %v12052_v54  ;;  %10981 = vmatpush3.bf16.xpose.msra.mxu1 %v10958_v36  ;;  %10121 = vmatprep.mubr.f32.mxu1 %v1841_v28 }
 0x2ae   :  { %v2310_v58 = vand.u32 4294901760, %v12054_v56 }
 0x2af   :  { %v2405_v59 = vsub.f32 %v12052_v54, %v2313_v57 }
 0x2b0   :  { %v12060_v60 = vpack.c.bf16 %v2313_v57, %v2310_v58  ;;  %v2398_v61 = vsub.f32 %v12054_v56, %v2310_v58 }
 0x2b1   :  { %v2406_v62 = vand.u32 4294901760, %v2405_v59 }
 0x2b2   :  { %10983 = vmatprep.subr.bf16.mxu0 %v12060_v60  ;;  %v2399_v63 = vand.u32 4294901760, %v2398_v61  ;;  %v12064_v0 = vpack.c.bf16 %v2405_v59, %v2398_v61 }
 0x2b3   :  { %10985 = vmatpush3.bf16.msra.mxu0 %v12060_v60  ;;  %v2407_v25 = vsub.f32 %v2405_v59, %v2406_v62 }
 0x2b4   :  { %10122 = vmatmul.mubr.f32.vlgmr.msra.gmra.mrb[2].mxu1 %v12031_v23  ;;  %v2400_v1 = vsub.f32 %v2398_v61, %v2399_v63  ;;  %v12068_v29 = vpack.c.bf16 %v2406_v62, %v2399_v63 }
 0x2b5   :  { %v2408_v2 = vand.u32 4294901760, %v2407_v25 }
 0x2b6   :  { %v2401_v3 = vand.u32 4294901760, %v2400_v1 }
 0x2b8   :  { %v12070_v4 = vpack.c.bf16 %v2408_v2, %v2401_v3 }
 0x2ba   :  { %10987 = vmatprep.subr.bf16.mxu0 %v12070_v4 }
 0x2f0   :  { %v2819_v5 = vpop.permute.xlu1 %2818 }
 0x2f1   :  { %v2826_v7 = vsel %vm1761_vm1, %v2819_v5, 0  ;;  %v2817_v30 = vpop.permute.xlu0 %2816 }
 0x2f2   :  { %v2832_v42 = vand.u32 4294901760, %v2826_v7  ;;  %v2824_v8 = vsel %vm1761_vm1, %v2817_v30, 0 }
 0x2f3   :  { %v2829_v9 = vand.u32 4294901760, %v2824_v8 }
 0x2f4   :  { %v2924_v11 = vsub.f32 %v2826_v7, %v2832_v42  ;;  %v2813_v12 = vpop.permute.xlu1 %2812 }
 0x2f5   :  { %v11006_v13 = vpack.c.bf16 %v2832_v42, %v2829_v9  ;;  %v2917_v14 = vsub.f32 %v2824_v8, %v2829_v9  ;;  %v2820_v16 = vsel %vm1761_vm1, %v2813_v12, 0 }
 0x2f6   :  { %v2925_v17 = vand.u32 4294901760, %v2924_v11  ;;  %v2895_v20 = vand.u32 4294901760, %v2820_v16 }
 0x2f7   :  { %v2918_v21 = vand.u32 4294901760, %v2917_v14  ;;  %11007 = vmatprep.subr.bf16.mxu1 %v11006_v13  ;;  %v11014_v10 = vpack.c.bf16 %v2924_v11, %v2917_v14 }
 0x2f8   :  { %v2926_v23 = vsub.f32 %v2924_v11, %v2925_v17  ;;  %v2896_v24 = vsub.f32 %v2820_v16, %v2895_v20  ;;  %v2815_v26 = vpop.permute.xlu1 %2814  ;;  %11009 = vmatpush3.bf16.xpose.msra.mxu1 %v11006_v13 }
 0x2f9   :  { %v2919_v27 = vsub.f32 %v2917_v14, %v2918_v21  ;;  %v2822_v28 = vsel %vm1761_vm1, %v2815_v26, 0  ;;  %v11022_v41 = vpack.c.bf16 %v2925_v17, %v2918_v21 }
 0x2fa   :  { %v2897_v31 = vand.u32 4294901760, %v2896_v24  ;;  %v2905_v32 = vand.u32 4294901760, %v2822_v28  ;;  %v2927_v33 = vand.u32 4294901760, %v2926_v23 }
 0x2fb   :  { %v2920_v34 = vand.u32 4294901760, %v2919_v27 }
 0x2fc   :  { %v2906_v35 = vsub.f32 %v2822_v28, %v2905_v32  ;;  %v2898_v36 = vsub.f32 %v2896_v24, %v2897_v31 }
 0x2fd   :  { %v11010_v37 = vpack.c.bf16 %v2927_v33, %v2920_v34 }
 0x2fe   :  { %v2907_v6 = vand.u32 4294901760, %v2906_v35  ;;  %v2899_v38 = vand.u32 4294901760, %v2898_v36 }
 0x2ff   :  { %11011 = vmatprep.subr.bf16.mxu1 %v11010_v37 }
 0x300   :  { %v2908_v39 = vsub.f32 %v2906_v35, %v2907_v6  ;;  %10170 = vmatprep.mubr.f32.mxu1 %v2899_v38 }
 0x302   :  { %v2909_v40 = vand.u32 4294901760, %v2908_v39 }
 0x304   :  { %10171 = vmatmul.mubr.f32.vlgmr.msra.gmra.mrb[4].mxu1 %v2909_v40 }
 0x305   :  { %11013 = vmatpush3.bf16.xpose.msra.mxu1 %v11010_v37  ;;  %10177 = vmatprep.mubr.f32.mxu1 %v2895_v20 }
 0x306   :  { %11015 = vmatprep.subr.bf16.mxu1 %v11014_v10 }
 0x30c   :  { %10178 = vmatmul.mubr.f32.vlgmr.msra.gmra.mrb[4].mxu1 %v2905_v32 }
 0x30d   :  { %11017 = vmatpush3.bf16.xpose.msra.mxu1 %v11014_v10  ;;  %10184 = vmatprep.mubr.f32.mxu1 %v2896_v24 }
 0x30e   :  { %11019 = vmatprep.subr.bf16.mxu1 %v11006_v13 }
 0x314   :  { %10185 = vmatmul.mubr.f32.vlgmr.msra.gmra.mrb[4].mxu1 %v2906_v35 }
 0x315   :  { %11021 = vmatpush3.bf16.xpose.msra.mxu1 %v11006_v13  ;;  %10191 = vmatprep.mubr.f32.mxu1 %v2897_v31 }
 0x316   :  { %11023 = vmatprep.subr.bf16.mxu1 %v11022_v41 }
 0x31c   :  { %10192 = vmatmul.mubr.f32.vlgmr.msra.gmra.mrb[4].mxu1 %v2907_v6 }
 0x31d   :  { %11025 = vmatpush3.bf16.xpose.msra.mxu1 %v11022_v41  ;;  %10198 = vmatprep.mubr.f32.mxu1 %v2895_v20 }
 0x31e   :  { %11027 = vmatprep.subr.bf16.mxu1 %v11006_v13 }
 0x324   :  { %10199 = vmatmul.mubr.f32.vlgmr.msra.gmra.mrb[4].mxu1 %v2905_v32 }
 0x325   :  { %11029 = vmatpush3.bf16.xpose.msra.mxu1 %v11006_v13  ;;  %10205 = vmatprep.mubr.f32.mxu1 %v2895_v20 }
 0x32c   :  { %10206 = vmatmul.mubr.f32.vlgmr.msra.gmra.mrb[4].mxu1 %v2905_v32 }
 0x387   :  { %v10123_v43 = vpop.f32.mrb[2].mxu1 }
 0x388   :  { %v2277_v45 = vmul.f32 0.35355338, %v10123_v43  ;;  %v2266_v46 = vpop.f32.mrb[3].mxu1 }
 0x389   :  { %v2276_v48 = vmul.f32 0.35355338, %v2266_v46 }
 0x38a   :  { %v2279_v49 = vadd.f32 %v2277_v45, %v12077_v44 }
 0x38b   :  { %v2278_v50 = vadd.f32 %v2276_v48, %v12079_v47 }
 0x38c   :  { %v2284_v51 = vsel %vm2280_vm2, %v2279_v49, -inf }
 0x38d   :  { %2285 = vmax.xlane.f32.xlu1 %v2284_v51  ;;  %v2281_v52 = vsel %vm2280_vm2, %v2278_v50, -inf }
 0x38e   :  { %2282 = vmax.xlane.f32.xlu0 %v2281_v52 }
 0x39e   :  { %4869 = vrot.lane.b32.xlu1 %v12023_v18, %s11711_s9 }
 0x3a2   :  { %4863 = vrot.lane.b32.xlu1 %v12025_v19, %s11711_s9 }
 0x3a6   :  { %4865 = vrot.lane.b32.xlu1 %v12021_v15, %s11711_s9 }
 0x3ff   :  { %v10207_v53 = vpop.f32.mrb[4].mxu1 }
 0x400   :  { %v3331_v55 = vmul.f32 0.35355338, %v10207_v53  ;;  %v3320_v57 = vpop.f32.mrb[5].mxu1 }
 0x401   :  { %v3330_v58 = vmul.f32 0.35355338, %v3320_v57 }
 0x402   :  { %v3333_v59 = vadd.f32 %v3331_v55, %v12077_v44 }
 0x403   :  { %v3332_v62 = vadd.f32 %v3330_v58, %v12079_v47 }
 0x404   :  { %v3337_v61 = vsel %vm2280_vm2, %v3333_v59, -inf }
 0x405   :  { %3338 = vmax.xlane.f32.xlu0 %v3337_v61  ;;  %v3334_v63 = vsel %vm2280_vm2, %v3332_v62, -inf }
 0x409   :  { %3335 = vmax.xlane.f32.xlu0 %v3334_v63 }
 0x41a   :  { %v2286_v25 = vpop.xlane.xlu1 %2285 }
 0x41b   :  { %v2288_v1 = vsub.f32 %v2279_v49, %v2286_v25  ;;  %v2283_v42 = vpop.xlane.xlu0 %2282 }
 0x41c   :  { %v2287_v9 = vsub.f32 %v2278_v50, %v2283_v42 }
 0x41d   :  { %v2291_v2 = vmul.f32 1.442695, %v2288_v1 }
 0x41e   :  { %v4870_v3 = vpop.permute.xlu1 %4869  ;;  %v2289_v16 = vmul.f32 1.442695, %v2287_v9 }
 0x41f   :  { %11588 = vpow2.f32 %v2291_v2  ;;  %4867 = vrot.lane.b32.xlu0 %v12029_v22, %s11711_s9  ;;  %v4877_v24 = vsel %vm1761_vm1, %v4870_v3, 0 }
 0x420   :  { %11590 = vpow2.f32 %v2289_v16  ;;  %v4883_v31 = vand.u32 4294901760, %v4877_v24 }
 0x422   :  { %v4864_v5 = vpop.permute.xlu1 %4863  ;;  %v4975_v35 = vsub.f32 %v4877_v24, %v4883_v31 }
 0x423   :  { %v4871_v7 = vsel %vm1761_vm1, %v4864_v5, 0 }
 0x424   :  { %v12098_v30 = vand.u32 4294901760, %v4871_v7  ;;  %v4976_v6 = vand.u32 4294901760, %v4975_v35 }
 0x426   :  { %v12101_v8 = vsub.f32 %v4871_v7, %v12098_v30  ;;  %v4866_v23 = vpop.permute.xlu1 %4865  ;;  %v4977_v41 = vsub.f32 %v4975_v35, %v4976_v6 }
 0x427   :  { %v4873_v27 = vsel %vm1761_vm1, %v4866_v23, 0 }
 0x428   :  { %v4948_v11 = vand.u32 4294901760, %v12101_v8  ;;  %v12125_v33 = vand.u32 4294901760, %v4873_v27  ;;  %v4978_v51 = vand.u32 4294901760, %v4977_v41 }
 0x429   :  { %v12104_v12 = vpop.eup %11588 }
 0x42a   :  { %v2296_v13 = vsel %vm2280_vm2, %v12104_v12, 0.0  ;;  %v4949_v14 = vsub.f32 %v12101_v8, %v4948_v11  ;;  %v12111_v20 = vpop.eup %11590 }
 0x42b   :  { %2297 = vadd.xlane.f32.xlu1 %v2296_v13  ;;  %v2293_v21 = vsel %vm2280_vm2, %v12111_v20, 0.0 }
 0x42c   :  { %v4950_v17 = vand.u32 4294901760, %v4949_v14 }
 0x42e   :  { %10314 = vmatprep.mubr.f32.mxu1 %v4950_v17 }
 0x43c   :  { %3360 = vrot.lane.b32.xlu1 %v12052_v54, %s11710_s5 }
 0x43e   :  { %2294 = vadd.xlane.f32.xlu0 %v2293_v21 }
 0x440   :  { %6423 = vrot.lane.b32.xlu1 %v12029_v22, %s11712_s17 }
 0x444   :  { %6425 = vrot.lane.b32.xlu1 %v12023_v18, %s11712_s17  ;;  %v4957_v18 = vsub.f32 %v4873_v27, %v12125_v33 }
 0x446   :  { %v4958_v39 = vand.u32 4294901760, %v4957_v18 }
 0x448   :  { %6421 = vrot.lane.b32.xlu1 %v12021_v15, %s11712_s17  ;;  %v4959_v46 = vsub.f32 %v4957_v18, %v4958_v39 }
 0x44a   :  { %v4960_v53 = vand.u32 4294901760, %v4959_v46 }
 0x492   :  { %v3339_v26 = vpop.xlane.xlu0 %3338 }
 0x493   :  { %v3341_v28 = vsub.f32 %v3333_v59, %v3339_v26 }
 0x495   :  { %v3344_v32 = vmul.f32 1.442695, %v3341_v28 }
 0x496   :  { %v3336_v34 = vpop.xlane.xlu0 %3335 }
 0x497   :  { %11592 = vpow2.f32 %v3344_v32  ;;  %v3340_v22 = vsub.f32 %v3332_v62, %v3336_v34 }
 0x499   :  { %v3342_v36 = vmul.f32 1.442695, %v3340_v22 }
 0x49a   :  { %v4868_v37 = vpop.permute.xlu0 %4867 }
 0x49b   :  { %11594 = vpow2.f32 %v3342_v36  ;;  %v4875_v15 = vsel %vm1761_vm1, %v4868_v37, 0 }
 0x49c   :  { %v4880_v38 = vand.u32 4294901760, %v4875_v15 }
 0x49e   :  { %v11054_v40 = vpack.c.bf16 %v4883_v31, %v4880_v38  ;;  %v4968_v10 = vsub.f32 %v4875_v15, %v4880_v38 }
 0x4a0   :  { %v4969_v43 = vand.u32 4294901760, %v4968_v10  ;;  %11055 = vmatprep.subr.bf16.mxu1 %v11054_v40  ;;  %v11062_v58 = vpack.c.bf16 %v4975_v35, %v4968_v10 }
 0x4a1   :  { %v12129_v45 = vpop.eup %11592  ;;  %11057 = vmatpush3.bf16.xpose.msra.mxu1 %v11054_v40 }
 0x4a2   :  { %v4970_v48 = vsub.f32 %v4968_v10, %v4969_v43  ;;  %v3349_v49 = vsel %vm2280_vm2, %v12129_v45, 0.0  ;;  %v11070_v61 = vpack.c.bf16 %v4976_v6, %v4969_v43 }
 0x4a3   :  { %3350 = vadd.xlane.f32.xlu0 %v3349_v49 }
 0x4a4   :  { %v4971_v50 = vand.u32 4294901760, %v4970_v48 }
 0x4a5   :  { %v12133_v52 = vpop.eup %11594 }
 0x4a6   :  { %v3346_v55 = vsel %vm2280_vm2, %v12133_v52, 0.0  ;;  %v11058_v57 = vpack.c.bf16 %v4978_v51, %v4971_v50 }
 0x4a7   :  { %3347 = vadd.xlane.f32.xlu0 %v3346_v55 }
 0x4a8   :  { %10315 = vmatmul.mubr.f32.vlgmr.msra.gmra.mrb[6].mxu1 %v4960_v53  ;;  %11059 = vmatprep.subr.bf16.mxu1 %v11058_v57 }
 0x4a9   :  { %11061 = vmatpush3.bf16.xpose.msra.mxu1 %v11058_v57  ;;  %10321 = vmatprep.mubr.f32.mxu1 %v12098_v30 }
 0x4aa   :  { %11063 = vmatprep.subr.bf16.mxu1 %v11062_v58 }
 0x4b0   :  { %10322 = vmatmul.mubr.f32.vlgmr.msra.gmra.mrb[6].mxu1 %v12125_v33 }
 0x4b1   :  { %11065 = vmatpush3.bf16.xpose.msra.mxu1 %v11062_v58  ;;  %10328 = vmatprep.mubr.f32.mxu1 %v12101_v8 }
 0x4b2   :  { %11067 = vmatprep.subr.bf16.mxu1 %v11054_v40 }
 0x4b8   :  { %v2298_v59 = vpop.xlane.xlu1 %2297  ;;  %10329 = vmatmul.mubr.f32.vlgmr.msra.gmra.mrb[6].mxu1 %v4957_v18 }
 0x4b9   :  { %11069 = vmatpush3.bf16.xpose.msra.mxu1 %v11054_v40  ;;  %10335 = vmatprep.mubr.f32.mxu1 %v4948_v11  ;;  %11596 = vrcp.f32 %v2298_v59 }
 0x4ba   :  { %11071 = vmatprep.subr.bf16.mxu1 %v11070_v61 }
 0x4bc   :  { %v12142_v62 = vpop.permute.xlu1 %3360 }
 0x4bd   :  { %3358 = vrot.lane.b32.xlu0 %v12054_v56, %s11710_s5 }
 0x4c0   :  { %v6424_v63 = vpop.permute.xlu1 %6423  ;;  %10336 = vmatmul.mubr.f32.vlgmr.msra.gmra.mrb[6].mxu1 %v4958_v39 }
 0x4c1   :  { %v6431_v25 = vsel %vm1761_vm1, %v6424_v63, 0  ;;  %6419 = vrot.lane.b32.xlu0 %v12025_v19, %s11712_s17  ;;  %11073 = vmatpush3.bf16.xpose.msra.mxu1 %v11070_v61 }
 0x4c2   :  { %v6436_v1 = vand.u32 4294901760, %v6431_v25  ;;  %10342 = vmatprep.mubr.f32.mxu1 %v12098_v30  ;;  %11075 = vmatprep.subr.bf16.mxu1 %v11054_v40 }
 0x4c3   :  { %v11597_v11 = vpop.eup %11596 }
 0x4c4   :  { %v6524_v2 = vsub.f32 %v6431_v25, %v6436_v1  ;;  %v6426_v3 = vpop.permute.xlu1 %6425  ;;  %v2302_v17 = vmul.f32 %v11597_v11, %v12104_v12 }
 0x4c5   :  { %v6433_v5 = vsel %vm1761_vm1, %v6426_v3, 0 }
 0x4c6   :  { %v6525_v7 = vand.u32 4294901760, %v6524_v2  ;;  %v6439_v42 = vand.u32 4294901760, %v6433_v5 }
 0x4c8   :  { %v12151_v8 = vpack.c.bf16 %v6439_v42, %v6436_v1  ;;  %v6531_v9 = vsub.f32 %v6433_v5, %v6439_v42  ;;  %10343 = vmatmul.mubr.f32.vlgmr.msra.gmra.mrb[6].mxu1 %v12125_v33  ;;  %v6526_v19 = vsub.f32 %v6524_v2, %v6525_v7 }
 0x4c9   :  { %11077 = vmatpush3.bf16.xpose.msra.mxu1 %v11054_v40  ;;  %10349 = vmatprep.mubr.f32.mxu1 %v12098_v30  ;;  %v2307_v30 = vsel %vm2280_vm2, %v2302_v17, 0 }
 0x4ca   :  { %v6532_v13 = vand.u32 4294901760, %v6531_v9  ;;  %11103 = vmatprep.subr.bf16.mxu1 %v12151_v8  ;;  %v12156_v14 = vpack.c.bf16 %v6531_v9, %v6524_v2  ;;  %v6527_v24 = vand.u32 4294901760, %v6526_v19  ;;  %v2386_v28 = vand.u32 4294901760, %v2307_v30 }
 0x4cb   :  { %v2295_v16 = vpop.xlane.xlu0 %2294 }
 0x4cc   :  { %v6533_v21 = vsub.f32 %v6531_v9, %v6532_v13  ;;  %11598 = vrcp.f32 %v2295_v16  ;;  %v12159_v23 = vpack.c.bf16 %v6532_v13, %v6525_v7  ;;  %v2387_v32 = vsub.f32 %v2307_v30, %v2386_v28 }
 0x4ce   :  { %v6534_v26 = vand.u32 4294901760, %v6533_v21  ;;  %v2388_v35 = vand.u32 4294901760, %v2387_v32 }
 0x4d0   :  { %10350 = vmatmul.mubr.f32.vlgmr.msra.gmra.mrb[6].mxu1 %v12125_v33  ;;  %v12162_v27 = vpack.c.bf16 %v6534_v26, %v6527_v24  ;;  %v2389_v33 = vsub.f32 %v2387_v32, %v2388_v35 }
 0x4d1   :  { %11105 = vmatpush3.bf16.xpose.msra.mxu1 %v12151_v8 }
 0x4d2   :  { %11107 = vmatprep.subr.bf16.mxu1 %v12162_v27  ;;  %v2390_v6 = vand.u32 4294901760, %v2389_v33 }
 0x4d6   :  { %v11599_v31 = vpop.eup %11598 }
 0x4d7   :  { %v2300_v12 = vmul.f32 %v11599_v31, %v12111_v20  ;;  %v6422_v20 = vpop.permute.xlu1 %6421 }
 0x4d8   :  { %v6429_v38 = vsel %vm1761_vm1, %v6422_v20, 0 }
 0x4d9   :  { %v2304_v34 = vsel %vm2280_vm2, %v2300_v12, 0 }
 0x4da   :  { %v2376_v22 = vand.u32 4294901760, %v2304_v34 }
 0x4dc   :  { %v2377_v36 = vsub.f32 %v2304_v34, %v2376_v22 }
 0x4de   :  { %v2378_v18 = vand.u32 4294901760, %v2377_v36 }
 0x4e0   :  { %v2379_v37 = vsub.f32 %v2377_v36, %v2378_v18 }
 0x4e2   :  { %v2380_v15 = vand.u32 4294901760, %v2379_v37 }
 0x4e4   :  { %10128 = vmatprep.mubr.f32.mxu0 %v2380_v15 }
 0x4e5   :  { %10129 = vmatmul.mubr.f32.vlgmr.msra.gmra.mrb[4].mxu0 %v2390_v6 }
 0x4e6   :  { %10989 = vmatpush3.bf16.msra.mxu0 %v12070_v4  ;;  %10135 = vmatprep.mubr.f32.mxu0 %v2376_v22  ;;  %v3374_v4 = vand.u32 4294901760, %v12142_v62 }
 0x4e7   :  { %10991 = vmatprep.subr.bf16.mxu0 %v12064_v0 }
 0x4e8   :  { %v12181_v40 = vsub.f32 %v12142_v62, %v3374_v4 }
 0x4ea   :  { %v3467_v41 = vand.u32 4294901760, %v12181_v40 }
 0x4ec   :  { %v3468_v53 = vsub.f32 %v12181_v40, %v3467_v41 }
 0x4ed   :  { %10136 = vmatmul.mubr.f32.vlgmr.msra.gmra.mrb[4].mxu0 %v2386_v28 }
 0x4ee   :  { %10993 = vmatpush3.bf16.msra.mxu0 %v12064_v0  ;;  %10142 = vmatprep.mubr.f32.mxu0 %v2377_v36  ;;  %v3469_v3 = vand.u32 4294901760, %v3468_v53 }
 0x4ef   :  { %10995 = vmatprep.subr.bf16.mxu0 %v12060_v60 }
 0x4f5   :  { %10143 = vmatmul.mubr.f32.vlgmr.msra.gmra.mrb[4].mxu0 %v2387_v32 }
 0x4f6   :  { %10997 = vmatpush3.bf16.msra.mxu0 %v12060_v60  ;;  %10149 = vmatprep.mubr.f32.mxu0 %v2378_v18  ;;  %v3872_v18 = vld [vmem:[%s12786_s10 + $0x8] sm:$0xff] }
 0x4f7   :  { %10999 = vmatprep.subr.bf16.mxu0 %v12068_v29  ;;  %v12244_v33 = vand.u32 4294901760, %v3872_v18 }
 0x4f9   :  { %v3967_v37 = vsub.f32 %v3872_v18, %v12244_v33 }
 0x4fb   :  { %v3968_v15 = vand.u32 4294901760, %v3967_v37 }
 0x4fd   :  { %10150 = vmatmul.mubr.f32.vlgmr.msra.gmra.mrb[4].mxu0 %v2388_v35  ;;  %v3969_v6 = vsub.f32 %v3967_v37, %v3968_v15 }
 0x4fe   :  { %11001 = vmatpush3.bf16.msra.mxu0 %v12068_v29  ;;  %10156 = vmatprep.mubr.f32.mxu0 %v2376_v22  ;;  %v12183_v29 = vand.u32 4294901760, %v6429_v38 }
 0x4ff   :  { %11003 = vmatprep.subr.bf16.mxu0 %v12060_v60 }
 0x500   :  { %v12187_v46 = vsub.f32 %v6429_v38, %v12183_v29 }
 0x502   :  { %v6514_v62 = vand.u32 4294901760, %v12187_v46 }
 0x504   :  { %v6515_v9 = vsub.f32 %v12187_v46, %v6514_v62 }
 0x505   :  { %10157 = vmatmul.mubr.f32.vlgmr.msra.gmra.mrb[4].mxu0 %v2386_v28 }
 0x506   :  { %11005 = vmatpush3.bf16.msra.mxu0 %v12060_v60  ;;  %10163 = vmatprep.mubr.f32.mxu0 %v2376_v22  ;;  %v6516_v24 = vand.u32 4294901760, %v6515_v9  ;;  %v2811_v9 = vld [vmem:[%s12786_s10] sm:$0xff] }
 0x50d   :  { %10164 = vmatmul.mubr.f32.vlgmr.msra.gmra.mrb[4].mxu0 %v2386_v28 }
 0x530   :  { %v3351_v0 = vpop.xlane.xlu0 %3350 }
 0x531   :  { %11600 = vrcp.f32 %v3351_v0  ;;  %v3970_v0 = vand.u32 4294901760, %v3969_v6 }
 0x534   :  { %v3348_v39 = vpop.xlane.xlu0 %3347 }
 0x535   :  { %11602 = vrcp.f32 %v3348_v39 }
 0x538   :  { %v3359_v10 = vpop.permute.xlu0 %3358 }
 0x539   :  { %v3371_v60 = vand.u32 4294901760, %v3359_v10 }
 0x53b   :  { %v11601_v43 = vpop.eup %11600  ;;  %v12189_v48 = vpack.c.bf16 %v3374_v4, %v3371_v60  ;;  %v3459_v49 = vsub.f32 %v3359_v10, %v3371_v60 }
 0x53c   :  { %v3355_v50 = vmul.f32 %v11601_v43, %v12129_v45  ;;  %v6420_v51 = vpop.permute.xlu0 %6419 }
 0x53d   :  { %v3460_v55 = vand.u32 4294901760, %v3459_v49  ;;  %v6427_v57 = vsel %vm1761_vm1, %v6420_v51, 0  ;;  %11031 = vmatprep.subr.bf16.mxu0 %v12189_v48  ;;  %v11038_v12 = vpack.c.bf16 %v12181_v40, %v3459_v49 }
 0x53e   :  { %v12197_v58 = vand.u32 4294901760, %v6427_v57  ;;  %11033 = vmatpush3.bf16.msra.mxu0 %v12189_v48  ;;  %v3368_v59 = vsel %vm2280_vm2, %v3355_v50, 0 }
 0x53f   :  { %v11603_v61 = vpop.eup %11602  ;;  %v3461_v45 = vsub.f32 %v3459_v49, %v3460_v55  ;;  %v12202_v63 = vand.u32 4294901760, %v3368_v59 }
 0x540   :  { %v3353_v25 = vmul.f32 %v11603_v61, %v12133_v52  ;;  %v6503_v1 = vsub.f32 %v6427_v57, %v12197_v58 }
 0x541   :  { %v3462_v2 = vand.u32 4294901760, %v3461_v45  ;;  %v3448_v5 = vsub.f32 %v3368_v59, %v12202_v63 }
 0x542   :  { %v6504_v7 = vand.u32 4294901760, %v6503_v1  ;;  %v3365_v42 = vsel %vm2280_vm2, %v3353_v25, 0 }
 0x543   :  { %v11034_v11 = vpack.c.bf16 %v3469_v3, %v3462_v2  ;;  %v3437_v19 = vand.u32 4294901760, %v3365_v42  ;;  %v3449_v16 = vand.u32 4294901760, %v3448_v5 }
 0x544   :  { %v6505_v13 = vsub.f32 %v6503_v1, %v6504_v7 }
 0x545   :  { %11035 = vmatprep.subr.bf16.mxu0 %v11034_v11  ;;  %v3438_v17 = vsub.f32 %v3365_v42, %v3437_v19  ;;  %v3450_v26 = vsub.f32 %v3448_v5, %v3449_v16 }
 0x546   :  { %v6506_v21 = vand.u32 4294901760, %v6505_v13 }
 0x547   :  { %v3439_v52 = vand.u32 4294901760, %v3438_v17  ;;  %v3451_v31 = vand.u32 4294901760, %v3450_v26 }
 0x548   :  { %10428 = vmatprep.mubr.f32.mxu1 %v6506_v21 }
 0x549   :  { %10429 = vmatmul.mubr.f32.vlgmr.msra.gmra.mrb[8].mxu1 %v6516_v24  ;;  %v3440_v30 = vsub.f32 %v3438_v17, %v3439_v52 }
 0x54a   :  { %11109 = vmatpush3.bf16.xpose.msra.mxu1 %v12162_v27  ;;  %10435 = vmatprep.mubr.f32.mxu1 %v12197_v58 }
 0x54b   :  { %11111 = vmatprep.subr.bf16.mxu1 %v12156_v14  ;;  %v3441_v28 = vand.u32 4294901760, %v3440_v30 }
 0x54d   :  { %10212 = vmatprep.mubr.f32.mxu0 %v3441_v28 }
 0x54e   :  { %10213 = vmatmul.mubr.f32.vlgmr.msra.gmra.mrb[6].mxu0 %v3451_v31 }
 0x54f   :  { %11037 = vmatpush3.bf16.msra.mxu0 %v11034_v11  ;;  %10219 = vmatprep.mubr.f32.mxu0 %v3437_v19 }
 0x550   :  { %11039 = vmatprep.subr.bf16.mxu0 %v11038_v12 }
 0x551   :  { %10436 = vmatmul.mubr.f32.vlgmr.msra.gmra.mrb[8].mxu1 %v12183_v29 }
 0x552   :  { %11113 = vmatpush3.bf16.xpose.msra.mxu1 %v12156_v14  ;;  %10442 = vmatprep.mubr.f32.mxu1 %v6503_v1  ;;  %v11046_v14 = vpack.c.bf16 %v3467_v41, %v3460_v55 }
 0x553   :  { %11115 = vmatprep.subr.bf16.mxu1 %v12151_v8 }
 0x556   :  { %10220 = vmatmul.mubr.f32.vlgmr.msra.gmra.mrb[6].mxu0 %v12202_v63 }
 0x557   :  { %11041 = vmatpush3.bf16.msra.mxu0 %v11038_v12  ;;  %10226 = vmatprep.mubr.f32.mxu0 %v3438_v17 }
 0x558   :  { %11043 = vmatprep.subr.bf16.mxu0 %v12189_v48 }
 0x559   :  { %10443 = vmatmul.mubr.f32.vlgmr.msra.gmra.mrb[8].mxu1 %v12187_v46 }
 0x55a   :  { %11117 = vmatpush3.bf16.xpose.msra.mxu1 %v12151_v8  ;;  %10449 = vmatprep.mubr.f32.mxu1 %v6504_v7 }
 0x55b   :  { %11119 = vmatprep.subr.bf16.mxu1 %v12159_v23 }
 0x55e   :  { %10227 = vmatmul.mubr.f32.vlgmr.msra.gmra.mrb[6].mxu0 %v3448_v5 }
 0x55f   :  { %11045 = vmatpush3.bf16.msra.mxu0 %v12189_v48  ;;  %10233 = vmatprep.mubr.f32.mxu0 %v3439_v52 }
 0x560   :  { %11047 = vmatprep.subr.bf16.mxu0 %v11046_v14 }
 0x561   :  { %10450 = vmatmul.mubr.f32.vlgmr.msra.gmra.mrb[8].mxu1 %v6514_v62 }
 0x562   :  { %11121 = vmatpush3.bf16.xpose.msra.mxu1 %v12159_v23  ;;  %10456 = vmatprep.mubr.f32.mxu1 %v12197_v58 }
 0x563   :  { %11123 = vmatprep.subr.bf16.mxu1 %v12151_v8 }
 0x566   :  { %10234 = vmatmul.mubr.f32.vlgmr.msra.gmra.mrb[6].mxu0 %v3449_v16 }
 0x567   :  { %11049 = vmatpush3.bf16.msra.mxu0 %v11046_v14  ;;  %10240 = vmatprep.mubr.f32.mxu0 %v3437_v19 }
 0x568   :  { %11051 = vmatprep.subr.bf16.mxu0 %v12189_v48 }
 0x569   :  { %10457 = vmatmul.mubr.f32.vlgmr.msra.gmra.mrb[8].mxu1 %v12183_v29 }
 0x56a   :  { %11125 = vmatpush3.bf16.xpose.msra.mxu1 %v12151_v8  ;;  %10463 = vmatprep.mubr.f32.mxu1 %v12197_v58 }
 0x56e   :  { %10241 = vmatmul.mubr.f32.vlgmr.msra.gmra.mrb[6].mxu0 %v12202_v63 }
 0x56f   :  { %11053 = vmatpush3.bf16.msra.mxu0 %v12189_v48  ;;  %10247 = vmatprep.mubr.f32.mxu0 %v3437_v19  ;;  %v4375_v19 = vand.u32 4294901760, %v2811_v9 }
 0x570   :  { %10250 = vmatprep.subr.mxu0 %v12244_v33 }
 0x571   :  { %10464 = vmatmul.mubr.f32.vlgmr.msra.gmra.mrb[8].mxu1 %v12183_v29  ;;  %v4462_v17 = vsub.f32 %v2811_v9, %v4375_v19 }
 0x573   :  { %v4463_v52 = vand.u32 4294901760, %v4462_v17 }
 0x575   :  { %v4464_v31 = vsub.f32 %v4462_v17, %v4463_v52 }
 0x576   :  { %10248 = vmatmul.mubr.f32.vlgmr.msra.gmra.mrb[6].mxu0 %v12202_v63 }
 0x577   :  { %10251 = vmatpush3.msra.mxu0 %v12244_v33 }
 0x578   :  { %10255 = vmatprep.subr.mxu0 %v3970_v0 }
 0x5a3   :  { %v10351_v23 = vpop.f32.mrb[6].mxu1 }
 0x5a4   :  { %v5382_v27 = vmul.f32 0.35355338, %v10351_v23  ;;  %v5371_v32 = vpop.f32.mrb[7].mxu1 }
 0x5a5   :  { %v5381_v34 = vmul.f32 0.35355338, %v5371_v32 }
 0x5a6   :  { %v5384_v22 = vadd.f32 %v5382_v27, %v12077_v44  ;;  %v4465_v27 = vand.u32 4294901760, %v4464_v31 }
 0x5a7   :  { %v5383_v35 = vadd.f32 %v5381_v34, %v12079_v47 }
 0x5a8   :  { %v5388_v8 = vsel %vm2280_vm2, %v5384_v22, -inf }
 0x5a9   :  { %5389 = vmax.xlane.f32.xlu1 %v5388_v8  ;;  %v5385_v36 = vsel %vm2280_vm2, %v5383_v35, -inf }
 0x5aa   :  { %5386 = vmax.xlane.f32.xlu0 %v5385_v36 }
 0x5ba   :  { %5409 = vrot.lane.b32.xlu1 %v12052_v54, %s11711_s9 }
 0x5e0   :  { %v10165_v4 = vpop.f32.mrb[4].mxu0 }
 0x5e1   :  { %v2801_v20 = vpop.f32.mrb[5].mxu0  ;;  %v4372_v13 = vsel %vm1761_vm1, %v10165_v4, 0 }
 0x5e2   :  { %v4369_v42 = vsel %vm1761_vm1, %v2801_v20, 0  ;;  %v4450_v21 = vand.u32 4294901760, %v4372_v13 }
 0x5e3   :  { %v4440_v11 = vand.u32 4294901760, %v4369_v42 }
 0x5e4   :  { %v4451_v30 = vsub.f32 %v4372_v13, %v4450_v21 }
 0x5e5   :  { %v4441_v16 = vsub.f32 %v4369_v42, %v4440_v11 }
 0x5e6   :  { %v4452_v14 = vand.u32 4294901760, %v4451_v30 }
 0x5e7   :  { %v4442_v24 = vand.u32 4294901760, %v4441_v16 }
 0x5e8   :  { %v4453_v34 = vsub.f32 %v4451_v30, %v4452_v14 }
 0x5e9   :  { %v4443_v28 = vsub.f32 %v4441_v16, %v4442_v24 }
 0x5eb   :  { %v4444_v23 = vand.u32 4294901760, %v4443_v28 }
 0x636   :  { %v5390_v38 = vpop.xlane.xlu1 %5389 }
 0x637   :  { %v5392_v39 = vsub.f32 %v5384_v22, %v5390_v38  ;;  %v5387_v40 = vpop.xlane.xlu0 %5386  ;;  %v4454_v22 = vand.u32 4294901760, %v4453_v34 }
 0x638   :  { %v5391_v29 = vsub.f32 %v5383_v35, %v5387_v40 }
 0x639   :  { %v5395_v10 = vmul.f32 1.442695, %v5392_v39 }
 0x63a   :  { %v5393_v41 = vmul.f32 1.442695, %v5391_v29 }
 0x63b   :  { %11604 = vpow2.f32 %v5395_v10 }
 0x63c   :  { %11606 = vpow2.f32 %v5393_v41 }
 0x644   :  { %v10465_v60 = vpop.f32.mrb[8].mxu1 }
 0x645   :  { %v12249_v43 = vpop.eup %11604  ;;  %v6927_v46 = vpop.f32.mrb[9].mxu1  ;;  %v6938_v26 = vmul.f32 0.35355338, %v10465_v60 }
 0x646   :  { %v6937_v48 = vmul.f32 0.35355338, %v6927_v46  ;;  %v5400_v49 = vsel %vm2280_vm2, %v12249_v43, 0.0  ;;  %v12253_v50 = vpop.eup %11606 }
 0x647   :  { %5401 = vadd.xlane.f32.xlu0 %v5400_v49  ;;  %v5397_v59 = vsel %vm2280_vm2, %v12253_v50, 0.0  ;;  %v12276_v12 = vadd.f32 %v6938_v26, %v12077_v44  ;;  %v5410_v44 = vpop.permute.xlu1 %5409 }
 0x648   :  { %v12256_v51 = vadd.f32 %v6937_v48, %v12079_v47  ;;  %v5423_v8 = vand.u32 4294901760, %v5410_v44 }
 0x649   :  { %v10249_v53 = vpop.f32.mrb[6].mxu0  ;;  %v6944_v32 = vsel %vm2280_vm2, %v12276_v12, -inf }
 0x64a   :  { %v3877_v55 = vsel %vm1761_vm1, %v10249_v53, 0  ;;  %v3862_v57 = vpop.f32.mrb[7].mxu0  ;;  %v6941_v58 = vsel %vm2280_vm2, %v12256_v51, -inf }
 0x64b   :  { %v3955_v61 = vand.u32 4294901760, %v3877_v55  ;;  %v3874_v62 = vsel %vm1761_vm1, %v3862_v57, 0  ;;  %6942 = vmax.xlane.f32.xlu1 %v6941_v58  ;;  %5398 = vadd.xlane.f32.xlu0 %v5397_v59 }
 0x64c   :  { %v3945_v45 = vand.u32 4294901760, %v3874_v62 }
 0x64d   :  { %v3956_v63 = vsub.f32 %v3877_v55, %v3955_v61 }
 0x64e   :  { %v3946_v25 = vsub.f32 %v3874_v62, %v3945_v45 }
 0x64f   :  { %v3957_v47 = vand.u32 4294901760, %v3956_v63 }
 0x650   :  { %v3947_v1 = vand.u32 4294901760, %v3946_v25 }
 0x651   :  { %v3958_v2 = vsub.f32 %v3956_v63, %v3957_v47 }
 0x652   :  { %v3948_v3 = vsub.f32 %v3946_v25, %v3947_v1 }
 0x653   :  { %v3959_v7 = vand.u32 4294901760, %v3958_v2 }
 0x654   :  { %v3949_v5 = vand.u32 4294901760, %v3948_v3 }
 0x656   :  { %10252 = vmatprep.mubr.f32.mxu0 %v3949_v5 }
 0x657   :  { %10253 = vmatmul.mubr.f32.vlgmr.msra.gmra.mrb[8].mxu0 %v3959_v7 }
 0x658   :  { %10257 = vmatprep.mubr.f32.mxu0 %v3945_v45  ;;  %10256 = vmatpush3.msra.mxu0 %v3970_v0 }
 0x659   :  { %10260 = vmatprep.subr.mxu0 %v3967_v37 }
 0x65f   :  { %10258 = vmatmul.mubr.f32.vlgmr.msra.gmra.mrb[8].mxu0 %v3955_v61 }
 0x660   :  { %10262 = vmatprep.mubr.f32.mxu0 %v3946_v25  ;;  %10261 = vmatpush3.msra.mxu0 %v3967_v37 }
 0x661   :  { %5407 = vrot.lane.b32.xlu0 %v12054_v56, %s11711_s9  ;;  %10265 = vmatprep.subr.mxu0 %v12244_v33 }
 0x667   :  { %10263 = vmatmul.mubr.f32.vlgmr.msra.gmra.mrb[8].mxu0 %v3956_v63 }
 0x668   :  { %10267 = vmatprep.mubr.f32.mxu0 %v3947_v1  ;;  %10266 = vmatpush3.msra.mxu0 %v12244_v33 }
 0x669   :  { %10270 = vmatprep.subr.mxu0 %v3968_v15 }
 0x66f   :  { %10268 = vmatmul.mubr.f32.vlgmr.msra.gmra.mrb[8].mxu0 %v3957_v47 }
 0x670   :  { %10272 = vmatprep.mubr.f32.mxu0 %v3945_v45  ;;  %10271 = vmatpush3.msra.mxu0 %v3968_v15 }
 0x671   :  { %10275 = vmatprep.subr.mxu0 %v12244_v33 }
 0x677   :  { %10273 = vmatmul.mubr.f32.vlgmr.msra.gmra.mrb[8].mxu0 %v3955_v61 }
 0x678   :  { %10277 = vmatprep.mubr.f32.mxu0 %v3945_v45  ;;  %10276 = vmatpush3.msra.mxu0 %v12244_v33  ;;  %v5515_v33 = vsub.f32 %v5410_v44, %v5423_v8 }
 0x679   :  { %10280 = vmatprep.subr.mxu0 %v4375_v19 }
 0x67a   :  { %v5516_v0 = vand.u32 4294901760, %v5515_v33 }
 0x67c   :  { %v5517_v29 = vsub.f32 %v5515_v33, %v5516_v0 }
 0x67e   :  { %v5518_v53 = vand.u32 4294901760, %v5517_v29 }
 0x67f   :  { %10278 = vmatmul.mubr.f32.vlgmr.msra.gmra.mrb[8].mxu0 %v3955_v61 }
 0x680   :  { %10282 = vmatprep.mubr.f32.mxu0 %v4444_v23  ;;  %6945 = vmax.xlane.f32.xlu0 %v6944_v32 }
 0x681   :  { %10281 = vmatpush3.msra.mxu0 %v4375_v19 }
 0x682   :  { %10285 = vmatprep.subr.mxu0 %v4465_v27 }
 0x687   :  { %10283 = vmatmul.mubr.f32.vlgmr.msra.gmra.mrb[8].mxu0 %v4454_v22 }
 0x688   :  { %10287 = vmatprep.mubr.f32.mxu0 %v4440_v11  ;;  %10286 = vmatpush3.msra.mxu0 %v4465_v27 }
 0x689   :  { %10290 = vmatprep.subr.mxu0 %v4462_v17 }
 0x68f   :  { %10288 = vmatmul.mubr.f32.vlgmr.msra.gmra.mrb[8].mxu0 %v4450_v21 }
 0x690   :  { %10292 = vmatprep.mubr.f32.mxu0 %v4441_v16  ;;  %10291 = vmatpush3.msra.mxu0 %v4462_v17 }
 0x691   :  { %10295 = vmatprep.subr.mxu0 %v4375_v19 }
 0x697   :  { %10293 = vmatmul.mubr.f32.vlgmr.msra.gmra.mrb[8].mxu0 %v4451_v30 }
 0x698   :  { %10297 = vmatprep.mubr.f32.mxu0 %v4442_v24  ;;  %10296 = vmatpush3.msra.mxu0 %v4375_v19 }
 0x699   :  { %10300 = vmatprep.subr.mxu0 %v4463_v52 }
 0x69f   :  { %10298 = vmatmul.mubr.f32.vlgmr.msra.gmra.mrb[8].mxu0 %v4452_v14 }
 0x6a0   :  { %10302 = vmatprep.mubr.f32.mxu0 %v4440_v11  ;;  %10301 = vmatpush3.msra.mxu0 %v4463_v52 }
 0x6a1   :  { %10305 = vmatprep.subr.mxu0 %v4375_v19 }
 0x6a7   :  { %10303 = vmatmul.mubr.f32.vlgmr.msra.gmra.mrb[8].mxu0 %v4450_v21 }
 0x6a8   :  { %10307 = vmatprep.mubr.f32.mxu0 %v4440_v11  ;;  %10306 = vmatpush3.msra.mxu0 %v4375_v19  ;;  %v5921_v11 = vld [vmem:[%s12786_s10 + $0x10] sm:$0xff] }
 0x6a9   :  { %v12298_v19 = vand.u32 4294901760, %v5921_v11 }
 0x6ab   :  { %v6016_v13 = vsub.f32 %v5921_v11, %v12298_v19 }
 0x6ad   :  { %v6017_v16 = vand.u32 4294901760, %v6016_v13 }
 0x6af   :  { %10308 = vmatmul.mubr.f32.vlgmr.msra.gmra.mrb[8].mxu0 %v4450_v21  ;;  %v6018_v17 = vsub.f32 %v6016_v13, %v6017_v16 }
 0x6b1   :  { %v6019_v21 = vand.u32 4294901760, %v6018_v17 }
 0x6d4   :  { %v5402_v35 = vpop.xlane.xlu0 %5401 }
 0x6d5   :  { %11608 = vrcp.f32 %v5402_v35 }
 0x6d8   :  { %v6943_v36 = vpop.xlane.xlu1 %6942  ;;  %v5399_v18 = vpop.xlane.xlu0 %5398 }
 0x6d9   :  { %v6947_v37 = vsub.f32 %v12256_v51, %v6943_v36  ;;  %11610 = vrcp.f32 %v5399_v18 }
 0x6db   :  { %v6949_v15 = vmul.f32 1.442695, %v6947_v37 }
 0x6dc   :  { %v5408_v6 = vpop.permute.xlu0 %5407 }
 0x6dd   :  { %11612 = vpow2.f32 %v6949_v15  ;;  %v5420_v4 = vand.u32 4294901760, %v5408_v6 }
 0x6df   :  { %v11609_v20 = vpop.eup %11608  ;;  %v11078_v38 = vpack.c.bf16 %v5423_v8, %v5420_v4  ;;  %v5508_v39 = vsub.f32 %v5408_v6, %v5420_v4 }
 0x6e0   :  { %v5406_v40 = vmul.f32 %v11609_v20, %v12249_v43 }
 0x6e1   :  { %v5509_v10 = vand.u32 4294901760, %v5508_v39  ;;  %11079 = vmatprep.subr.bf16.mxu0 %v11078_v38  ;;  %v11086_v2 = vpack.c.bf16 %v5515_v33, %v5508_v39 }
 0x6e2   :  { %11081 = vmatpush3.bf16.msra.mxu0 %v11078_v38  ;;  %v5417_v41 = vsel %vm2280_vm2, %v5406_v40, 0 }
 0x6e3   :  { %v11611_v60 = vpop.eup %11610  ;;  %v5510_v46 = vsub.f32 %v5508_v39, %v5509_v10  ;;  %v5496_v48 = vand.u32 4294901760, %v5417_v41  ;;  %v11094_v3 = vpack.c.bf16 %v5516_v0, %v5509_v10 }
 0x6e4   :  { %v5404_v49 = vmul.f32 %v11611_v60, %v12253_v50 }
 0x6e5   :  { %v5511_v51 = vand.u32 4294901760, %v5510_v46  ;;  %v5497_v55 = vsub.f32 %v5417_v41, %v5496_v48 }
 0x6e6   :  { %v5414_v57 = vsel %vm2280_vm2, %v5404_v49, 0 }
 0x6e7   :  { %v12285_v58 = vpop.eup %11612  ;;  %v11082_v59 = vpack.c.bf16 %v5518_v53, %v5511_v51  ;;  %v5486_v43 = vand.u32 4294901760, %v5414_v57  ;;  %v5498_v62 = vand.u32 4294901760, %v5497_v55 }
 0x6e8   :  { %v6953_v61 = vsel %vm2280_vm2, %v12285_v58, 0.0 }
 0x6e9   :  { %6954 = vadd.xlane.f32.xlu0 %v6953_v61  ;;  %11083 = vmatprep.subr.bf16.mxu0 %v11082_v59  ;;  %v5487_v45 = vsub.f32 %v5414_v57, %v5486_v43  ;;  %v5499_v25 = vsub.f32 %v5497_v55, %v5498_v62 }
 0x6eb   :  { %v5488_v63 = vand.u32 4294901760, %v5487_v45  ;;  %v5500_v1 = vand.u32 4294901760, %v5499_v25 }
 0x6ed   :  { %v5489_v47 = vsub.f32 %v5487_v45, %v5488_v63 }
 0x6ef   :  { %v5490_v50 = vand.u32 4294901760, %v5489_v47  ;;  %v7477_v47 = vld [vmem:[%s12786_s10 + $0x18] sm:$0xff] }
 0x6f1   :  { %10356 = vmatprep.mubr.f32.mxu0 %v5490_v50  ;;  %v7485_v50 = vand.u32 4294901760, %v7477_v47 }
 0x6f2   :  { %10357 = vmatmul.mubr.f32.vlgmr.msra.gmra.mrb[10].mxu0 %v5500_v1 }
 0x6f3   :  { %11085 = vmatpush3.bf16.msra.mxu0 %v11082_v59  ;;  %10363 = vmatprep.mubr.f32.mxu0 %v5486_v43  ;;  %v7572_v1 = vsub.f32 %v7477_v47, %v7485_v50 }
 0x6f4   :  { %11087 = vmatprep.subr.bf16.mxu0 %v11086_v2 }
 0x6fa   :  { %10364 = vmatmul.mubr.f32.vlgmr.msra.gmra.mrb[10].mxu0 %v5496_v48 }
 0x6fb   :  { %11089 = vmatpush3.bf16.msra.mxu0 %v11086_v2  ;;  %10370 = vmatprep.mubr.f32.mxu0 %v5487_v45  ;;  %v7573_v2 = vand.u32 4294901760, %v7572_v1 }
 0x6fc   :  { %11091 = vmatprep.subr.bf16.mxu0 %v11078_v38 }
 0x6ff   :  { %6963 = vrot.lane.b32.xlu0 %v12054_v56, %s11712_s17 }
 0x702   :  { %10371 = vmatmul.mubr.f32.vlgmr.msra.gmra.mrb[10].mxu0 %v5497_v55 }
 0x703   :  { %11093 = vmatpush3.bf16.msra.mxu0 %v11078_v38  ;;  %10377 = vmatprep.mubr.f32.mxu0 %v5488_v63 }
 0x704   :  { %11095 = vmatprep.subr.bf16.mxu0 %v11094_v3 }
 0x70a   :  { %10378 = vmatmul.mubr.f32.vlgmr.msra.gmra.mrb[10].mxu0 %v5498_v62 }
 0x70b   :  { %11097 = vmatpush3.bf16.msra.mxu0 %v11094_v3  ;;  %10384 = vmatprep.mubr.f32.mxu0 %v5486_v43  ;;  %v7574_v3 = vsub.f32 %v7572_v1, %v7573_v2 }
 0x70c   :  { %11099 = vmatprep.subr.bf16.mxu0 %v11078_v38 }
 0x70d   :  { %v6946_v5 = vpop.xlane.xlu0 %6945 }
 0x70e   :  { %v6948_v7 = vsub.f32 %v12276_v12, %v6946_v5  ;;  %v7575_v5 = vand.u32 4294901760, %v7574_v3 }
 0x710   :  { %v6951_v42 = vmul.f32 1.442695, %v6948_v7 }
 0x712   :  { %11614 = vpow2.f32 %v6951_v42  ;;  %10385 = vmatmul.mubr.f32.vlgmr.msra.gmra.mrb[10].mxu0 %v5496_v48 }
 0x713   :  { %11101 = vmatpush3.bf16.msra.mxu0 %v11078_v38  ;;  %10391 = vmatprep.mubr.f32.mxu0 %v5486_v43 }
 0x714   :  { %10394 = vmatprep.subr.mxu0 %v12298_v19 }
 0x71a   :  { %10392 = vmatmul.mubr.f32.vlgmr.msra.gmra.mrb[10].mxu0 %v5496_v48 }
 0x71b   :  { %10395 = vmatpush3.msra.mxu0 %v12298_v19 }
 0x71c   :  { %v11615_v9 = vpop.eup %11614  ;;  %10399 = vmatprep.subr.mxu0 %v6019_v21 }
 0x71d   :  { %v6956_v56 = vsel %vm2280_vm2, %v11615_v9, 0.0 }
 0x71e   :  { %6957 = vadd.xlane.f32.xlu1 %v6956_v56 }
 0x72f   :  { %6965 = vrot.lane.b32.xlu1 %v12052_v54, %s11712_s17 }
 0x776   :  { %v6955_v44 = vpop.xlane.xlu0 %6954 }
 0x777   :  { %11616 = vrcp.f32 %v6955_v44 }
 0x77a   :  { %v6964_v37 = vpop.permute.xlu0 %6963 }
 0x77b   :  { %v6976_v4 = vand.u32 4294901760, %v6964_v37 }
 0x77d   :  { %v7064_v40 = vsub.f32 %v6964_v37, %v6976_v4 }
 0x77f   :  { %v7065_v60 = vand.u32 4294901760, %v7064_v40 }
 0x781   :  { %v11617_v8 = vpop.eup %11616  ;;  %v7066_v53 = vsub.f32 %v7064_v40, %v7065_v60 }
 0x782   :  { %v6960_v18 = vmul.f32 %v11617_v8, %v12285_v58 }
 0x783   :  { %v7067_v59 = vand.u32 4294901760, %v7066_v53 }
 0x784   :  { %v6970_v0 = vsel %vm2280_vm2, %v6960_v18, 0 }
 0x785   :  { %v7042_v20 = vand.u32 4294901760, %v6970_v0 }
 0x787   :  { %v7043_v10 = vsub.f32 %v6970_v0, %v7042_v20 }
 0x789   :  { %v7044_v48 = vand.u32 4294901760, %v7043_v10 }
 0x78b   :  { %v7045_v57 = vsub.f32 %v7043_v10, %v7044_v48 }
 0x78d   :  { %v7046_v61 = vand.u32 4294901760, %v7045_v57 }
 0x7ab   :  { %v6958_v35 = vpop.xlane.xlu1 %6957 }
 0x7ac   :  { %11618 = vrcp.f32 %v6958_v35 }
 0x7af   :  { %v6966_v33 = vpop.permute.xlu1 %6965 }
 0x7b0   :  { %v6979_v6 = vand.u32 4294901760, %v6966_v33 }
 0x7b2   :  { %v7071_v39 = vsub.f32 %v6966_v33, %v6979_v6  ;;  %v11126_v49 = vpack.c.bf16 %v6979_v6, %v6976_v4 }
 0x7b4   :  { %v7072_v41 = vand.u32 4294901760, %v7071_v39  ;;  %v11134_v63 = vpack.c.bf16 %v7071_v39, %v7064_v40 }
 0x7b6   :  { %v11619_v36 = vpop.eup %11618  ;;  %v7073_v51 = vsub.f32 %v7071_v39, %v7072_v41  ;;  %v11142_v25 = vpack.c.bf16 %v7072_v41, %v7065_v60  ;;  %v8032_v39 = vld [vmem:[%s12790_s14 + $0x10] sm:$0xff] }
 0x7b7   :  { %v6962_v15 = vmul.f32 %v11619_v36, %v11615_v9  ;;  %v8054_v41 = vand.u32 4294901760, %v8032_v39 }
 0x7b8   :  { %v7074_v58 = vand.u32 4294901760, %v7073_v51 }
 0x7b9   :  { %v6973_v38 = vsel %vm2280_vm2, %v6962_v15, 0 }
 0x7ba   :  { %v7052_v29 = vand.u32 4294901760, %v6973_v38  ;;  %v11130_v62 = vpack.c.bf16 %v7074_v58, %v7067_v59  ;;  %v8152_v59 = vsub.f32 %v8032_v39, %v8054_v41 }
 0x7bc   :  { %v7053_v46 = vsub.f32 %v6973_v38, %v7052_v29  ;;  %v8031_v38 = vld [vmem:[%s12790_s14 + $0x8] sm:$0xff] }
 0x7be   :  { %v7054_v55 = vand.u32 4294901760, %v7053_v46 }
 0x7c0   :  { %v7055_v43 = vsub.f32 %v7053_v46, %v7054_v55 }
 0x7c2   :  { %v7056_v45 = vand.u32 4294901760, %v7055_v43 }
 0x7ed   :  { %v10393_v24 = vpop.f32.mrb[10].mxu0 }
 0x7ee   :  { %v5926_v52 = vsel %vm1761_vm1, %v10393_v24, 0  ;;  %v5911_v54 = vpop.f32.mrb[11].mxu0 }
 0x7ef   :  { %v12304_v26 = vand.u32 4294901760, %v5926_v52  ;;  %v5923_v30 = vsel %vm1761_vm1, %v5911_v54, 0 }
 0x7f0   :  { %v5994_v28 = vand.u32 4294901760, %v5923_v30 }
 0x7f1   :  { %v6005_v31 = vsub.f32 %v5926_v52, %v12304_v26 }
 0x7f2   :  { %v5995_v12 = vsub.f32 %v5923_v30, %v5994_v28  ;;  %v9363_v30 = vld [vmem:[%s12787_s11] ss:$0 sm:$0xff] }
 0x7f3   :  { %v6006_v14 = vand.u32 4294901760, %v6005_v31 }
 0x7f4   :  { %v5996_v23 = vand.u32 4294901760, %v5995_v12 }
 0x7f5   :  { %v6007_v27 = vsub.f32 %v6005_v31, %v6006_v14 }
 0x7f6   :  { %v5997_v32 = vsub.f32 %v5995_v12, %v5996_v23 }
 0x7f7   :  { %v6008_v22 = vand.u32 4294901760, %v6007_v27 }
 0x7f8   :  { %v5998_v34 = vand.u32 4294901760, %v5997_v32  ;;  %v11633_v32 = vld [vmem:[#allocation2] sm:$0xff] }
 0x7fa   :  { %10396 = vmatprep.mubr.f32.mxu0 %v5998_v34 }
 0x7fb   :  { %10397 = vmatmul.mubr.f32.vlgmr.msra.gmra.mrb[8].mxu0 %v6008_v22 }
 0x7fc   :  { %10400 = vmatpush3.msra.mxu0 %v6019_v21  ;;  %10401 = vmatprep.mubr.f32.mxu0 %v5994_v28 }
 0x7fd   :  { %10404 = vmatprep.subr.mxu0 %v6016_v13 }
 0x803   :  { %10402 = vmatmul.mubr.f32.vlgmr.msra.gmra.mrb[8].mxu0 %v12304_v26 }
 0x804   :  { %10405 = vmatpush3.msra.mxu0 %v6016_v13  ;;  %10406 = vmatprep.mubr.f32.mxu0 %v5995_v12 }
 0x805   :  { %10409 = vmatprep.subr.mxu0 %v12298_v19 }
 0x80b   :  { %10407 = vmatmul.mubr.f32.vlgmr.msra.gmra.mrb[8].mxu0 %v6005_v31 }
 0x80c   :  { %10410 = vmatpush3.msra.mxu0 %v12298_v19  ;;  %10411 = vmatprep.mubr.f32.mxu0 %v5996_v23  ;;  %v11632_v23 = vld [vmem:[#allocation2 + $0x8] sm:$0xff] }
 0x80d   :  { %10414 = vmatprep.subr.mxu0 %v6017_v16 }
 0x813   :  { %10412 = vmatmul.mubr.f32.vlgmr.msra.gmra.mrb[8].mxu0 %v6006_v14 }
 0x814   :  { %10415 = vmatpush3.msra.mxu0 %v6017_v16  ;;  %10416 = vmatprep.mubr.f32.mxu0 %v5994_v28 }
 0x815   :  { %10419 = vmatprep.subr.mxu0 %v12298_v19 }
 0x81b   :  { %10417 = vmatmul.mubr.f32.vlgmr.msra.gmra.mrb[8].mxu0 %v12304_v26 }
 0x81c   :  { %10420 = vmatpush3.msra.mxu0 %v12298_v19  ;;  %10421 = vmatprep.mubr.f32.mxu0 %v5994_v28 }
 0x81d   :  { %11127 = vmatprep.subr.bf16.mxu0 %v11126_v49 }
 0x823   :  { %10422 = vmatmul.mubr.f32.vlgmr.msra.gmra.mrb[8].mxu0 %v12304_v26 }
 0x824   :  { %11129 = vmatpush3.bf16.msra.mxu0 %v11126_v49  ;;  %10470 = vmatprep.mubr.f32.mxu0 %v7046_v61 }
 0x825   :  { %11131 = vmatprep.subr.bf16.mxu0 %v11130_v62 }
 0x827   :  { %10471 = vmatmul.mubr.f32.vlgmr.msra.gmra.mrb[12].mxu0 %v7056_v45  ;;  %v8153_v45 = vand.u32 4294901760, %v8152_v59 }
 0x828   :  { %11133 = vmatpush3.bf16.msra.mxu0 %v11130_v62  ;;  %10477 = vmatprep.mubr.f32.mxu0 %v7042_v20 }
 0x829   :  { %11135 = vmatprep.subr.bf16.mxu0 %v11134_v63  ;;  %v8154_v47 = vsub.f32 %v8152_v59, %v8153_v45 }
 0x82f   :  { %10478 = vmatmul.mubr.f32.vlgmr.msra.gmra.mrb[12].mxu0 %v7052_v29 }
 0x830   :  { %11137 = vmatpush3.bf16.msra.mxu0 %v11134_v63  ;;  %10484 = vmatprep.mubr.f32.mxu0 %v7043_v10  ;;  %v8033_v10 = vld [vmem:[%s12790_s14 + $0x18] sm:$0xff] }
 0x831   :  { %11139 = vmatprep.subr.bf16.mxu0 %v11126_v49  ;;  %v8057_v60 = vand.u32 4294901760, %v8033_v10 }
 0x833   :  { %v8159_v43 = vsub.f32 %v8033_v10, %v8057_v60 }
 0x835   :  { %v8160_v63 = vand.u32 4294901760, %v8159_v43 }
 0x837   :  { %10485 = vmatmul.mubr.f32.vlgmr.msra.gmra.mrb[12].mxu0 %v7053_v46 }
 0x838   :  { %11141 = vmatpush3.bf16.msra.mxu0 %v11126_v49  ;;  %10491 = vmatprep.mubr.f32.mxu0 %v7044_v48  ;;  %v12352_v48 = vpack.c.bf16 %v8057_v60, %v8054_v41 }
 0x839   :  { %11143 = vmatprep.subr.bf16.mxu0 %v11142_v25 }
 0x83f   :  { %10492 = vmatmul.mubr.f32.vlgmr.msra.gmra.mrb[12].mxu0 %v7054_v55 }
 0x840   :  { %11145 = vmatpush3.bf16.msra.mxu0 %v11142_v25  ;;  %10498 = vmatprep.mubr.f32.mxu0 %v7042_v20 }
 0x841   :  { %11147 = vmatprep.subr.bf16.mxu0 %v11126_v49 }
 0x847   :  { %10499 = vmatmul.mubr.f32.vlgmr.msra.gmra.mrb[12].mxu0 %v7052_v29 }
 0x848   :  { %11149 = vmatpush3.bf16.msra.mxu0 %v11126_v49  ;;  %10505 = vmatprep.mubr.f32.mxu0 %v7042_v20  ;;  %v8030_v20 = vld [vmem:[%s12790_s14] sm:$0xff] }
 0x849   :  { %10508 = vmatprep.subr.mxu0 %v7485_v50  ;;  %v8048_v40 = vand.u32 4294901760, %v8030_v20 }
 0x84b   :  { %v8138_v49 = vsub.f32 %v8030_v20, %v8048_v40 }
 0x84d   :  { %v8139_v53 = vand.u32 4294901760, %v8138_v49 }
 0x84f   :  { %10506 = vmatmul.mubr.f32.vlgmr.msra.gmra.mrb[12].mxu0 %v7052_v29  ;;  %v8051_v29 = vand.u32 4294901760, %v8031_v38  ;;  %v8140_v57 = vsub.f32 %v8138_v49, %v8139_v53 }
 0x850   :  { %10509 = vmatpush3.msra.mxu0 %v7485_v50 }
 0x851   :  { %10513 = vmatprep.subr.mxu0 %v7575_v5  ;;  %v12350_v46 = vpack.c.bf16 %v8051_v29, %v8048_v40  ;;  %v8145_v51 = vsub.f32 %v8031_v38, %v8051_v29  ;;  %v8141_v61 = vand.u32 4294901760, %v8140_v57  ;;  %v12395_v40 = vld [vmem:[%s12792_s16 + $0x10] sm:$0xff]  ;;  %v12400_v29 = vld [vmem:[%s12792_s16 + $0x18] sm:$0xff] }
 0x852   :  { %v8659_v10 = vand.u32 4294901760, %v12395_v40  ;;  %v8662_v41 = vand.u32 4294901760, %v12400_v29  ;;  %v12444_v57 = vld [vmem:[%s12792_s16 + $0x38] sm:$0xff] }
 0x853   :  { %11151 = vmatprep.subr.bf16.mxu1 %v12350_v46  ;;  %v8146_v55 = vand.u32 4294901760, %v8145_v51 }
 0x854   :  { %11153 = vmatpush3.bf16.msra.mxu1 %v12350_v46  ;;  %v12412_v60 = vpack.c.bf16 %v8662_v41, %v8659_v10 }
 0x855   :  { %11155 = vmatprep.subr.bf16.mxu1 %v12352_v48  ;;  %v8147_v58 = vsub.f32 %v8145_v51, %v8146_v55 }
 0x857   :  { %v8148_v62 = vand.u32 4294901760, %v8147_v58 }
 0x858   :  { %11157 = vmatpush3.bf16.msra.mxu1 %v12352_v48 }
 0x859   :  { %v11158_v25 = vpack.c.bf16 %v8148_v62, %v8141_v61  ;;  %v12461_v61 = vld [vmem:[%s12792_s16 + $0x40] sm:$0xff]  ;;  %v12466_v62 = vld [vmem:[%s12792_s16 + $0x48] sm:$0xff] }
 0x85b   :  { %11159 = vmatprep.subr.bf16.mxu1 %v11158_v25 }
 0x922   :  { %v10507_v7 = vpop.f32.mrb[12].mxu0 }
 0x923   :  { %v7482_v42 = vsel %vm1761_vm1, %v10507_v7, 0  ;;  %v7467_v9 = vpop.f32.mrb[13].mxu0  ;;  %v11170_v7 = vpack.c.bf16 %v8159_v43, %v8152_v59  ;;  %v8674_v59 = vand.u32 4294901760, %v12444_v57 }
 0x924   :  { %v7560_v56 = vand.u32 4294901760, %v7482_v42  ;;  %v7479_v11 = vsel %vm1761_vm1, %v7467_v9, 0  ;;  %v11186_v9 = vpack.c.bf16 %v8160_v63, %v8153_v45  ;;  %v8677_v45 = vand.u32 4294901760, %v12461_v61 }
 0x925   :  { %v7550_v19 = vand.u32 4294901760, %v7479_v11 }
 0x926   :  { %v7561_v13 = vsub.f32 %v7482_v42, %v7560_v56  ;;  %v11182_v42 = vpack.c.bf16 %v8146_v55, %v8139_v53  ;;  %v12439_v55 = vld [vmem:[%s12792_s16 + $0x30] sm:$0xff] }
 0x927   :  { %v7551_v16 = vsub.f32 %v7479_v11, %v7550_v19  ;;  %v8671_v58 = vand.u32 4294901760, %v12439_v55 }
 0x928   :  { %v7562_v17 = vand.u32 4294901760, %v7561_v13 }
 0x929   :  { %v7552_v21 = vand.u32 4294901760, %v7551_v16 }
 0x92a   :  { %v7563_v24 = vsub.f32 %v7561_v13, %v7562_v17 }
 0x92b   :  { %v7553_v52 = vsub.f32 %v7551_v16, %v7552_v21 }
 0x92c   :  { %v7564_v26 = vand.u32 4294901760, %v7563_v24  ;;  %v9364_v24 = vld [vmem:[%s12788_s12] ss:$0 sm:$0xff] }
 0x92d   :  { %v7554_v54 = vand.u32 4294901760, %v7553_v52 }
 0x92f   :  { %10510 = vmatprep.mubr.f32.mxu0 %v7554_v54 }
 0x930   :  { %10511 = vmatmul.mubr.f32.vlgmr.msra.gmra.mrb[8].mxu0 %v7564_v26 }
 0x931   :  { %10514 = vmatpush3.msra.mxu0 %v7575_v5  ;;  %10515 = vmatprep.mubr.f32.mxu0 %v7550_v19  ;;  %v11166_v5 = vpack.c.bf16 %v8145_v51, %v8138_v49 }
 0x932   :  { %10518 = vmatprep.subr.mxu0 %v7572_v1 }
 0x938   :  { %10516 = vmatmul.mubr.f32.vlgmr.msra.gmra.mrb[8].mxu0 %v7560_v56 }
 0x939   :  { %10519 = vmatpush3.msra.mxu0 %v7572_v1  ;;  %10520 = vmatprep.mubr.f32.mxu0 %v7551_v16  ;;  %v8155_v1 = vand.u32 4294901760, %v8154_v47  ;;  %v12483_v47 = vld [vmem:[%s12792_s16 + $0x50] sm:$0xff] }
 0x93a   :  { %10523 = vmatprep.subr.mxu0 %v7485_v50 }
 0x940   :  { %10521 = vmatmul.mubr.f32.vlgmr.msra.gmra.mrb[8].mxu0 %v7561_v13 }
 0x941   :  { %10524 = vmatpush3.msra.mxu0 %v7485_v50  ;;  %10525 = vmatprep.mubr.f32.mxu0 %v7552_v21 }
 0x942   :  { %10528 = vmatprep.subr.mxu0 %v7573_v2 }
 0x948   :  { %10526 = vmatmul.mubr.f32.vlgmr.msra.gmra.mrb[8].mxu0 %v7562_v17 }
 0x949   :  { %10529 = vmatpush3.msra.mxu0 %v7573_v2  ;;  %10530 = vmatprep.mubr.f32.mxu0 %v7550_v19 }
 0x94a   :  { %10533 = vmatprep.subr.mxu0 %v7485_v50 }
 0x950   :  { %10531 = vmatmul.mubr.f32.vlgmr.msra.gmra.mrb[8].mxu0 %v7560_v56 }
 0x951   :  { %10534 = vmatpush3.msra.mxu0 %v7485_v50  ;;  %10535 = vmatprep.mubr.f32.mxu0 %v7550_v19  ;;  %v8161_v50 = vsub.f32 %v8159_v43, %v8160_v63  ;;  %v12456_v43 = vpack.c.bf16 %v8674_v59, %v8671_v58  ;;  %v8680_v63 = vand.u32 4294901760, %v12466_v62 }
 0x953   :  { %v8162_v2 = vand.u32 4294901760, %v8161_v50  ;;  %v12488_v50 = vld [vmem:[%s12792_s16 + $0x58] sm:$0xff] }
 0x955   :  { %v11162_v3 = vpack.c.bf16 %v8162_v2, %v8155_v1  ;;  %v8683_v1 = vand.u32 4294901760, %v12483_v47  ;;  %v8686_v2 = vand.u32 4294901760, %v12488_v50 }
 0x958   :  { %10536 = vmatmul.mubr.f32.vlgmr.msra.gmra.mrb[8].mxu0 %v7560_v56 }
 0xa2b   :  { %v10537_v28 = vpop.f32.mrb[8].mxu0 }
 0xa2c   :  { %v7983_v31 = vadd.f32 %v10537_v28, %v9363_v30  ;;  %v7963_v12 = vpop.f32.mrb[9].mxu0 }
 0xa2d   :  { %v7982_v14 = vadd.f32 %v9363_v30, %v7963_v12  ;;  %v9365_v30 = vld [vmem:[%s12789_s13] ss:$0 sm:$0xff] }
 0xa2e   :  { %v12326_v27 = vadd.f32 %v11632_v23, %v7983_v31 }
 0xa2f   :  { %v12328_v34 = vadd.f32 %v11633_v32, %v7982_v14 }
 0xa30   :  { %v7991_v22 = vsel %vm92_vm0, %v12326_v27, 0.0 }
 0xa31   :  { %7992 = vadd.xlane.f32.xlu0 %v7991_v22  ;;  %v7988_v44 = vsel %vm92_vm0, %v12328_v34, 0.0 }
 0xa32   :  { %7989 = vadd.xlane.f32.xlu1 %v7988_v44 }
 0xabe   :  { %v7993_v35 = vpop.xlane.xlu0 %7992 }
 0xabf   :  { %v7995_v8 = vmul.f32 0.03125, %v7993_v35  ;;  %v7990_v36 = vpop.xlane.xlu1 %7989 }
 0xac0   :  { %v7994_v18 = vmul.f32 0.03125, %v7990_v36 }
 0xac1   :  { %v7997_v33 = vsub.f32 %v12326_v27, %v7995_v8 }
 0xac2   :  { %v7996_v37 = vsub.f32 %v12328_v34, %v7994_v18 }
 0xac3   :  { %v7999_v15 = vmul.f32 %v7997_v33, %v7997_v33 }
 0xac4   :  { %v7998_v6 = vmul.f32 %v7996_v37, %v7996_v37 }
 0xac5   :  { %v8003_v0 = vsel %vm92_vm0, %v7999_v15, 0.0 }
 0xac6   :  { %8004 = vadd.xlane.f32.xlu1 %v8003_v0  ;;  %v8000_v4 = vsel %vm92_vm0, %v7998_v6, 0.0  ;;  %v12377_v0 = vld [vmem:[%s12792_s16] sm:$0xff] }
 0xac7   :  { %8001 = vadd.xlane.f32.xlu0 %v8000_v4  ;;  %v12382_v4 = vld [vmem:[%s12792_s16 + $0x8] sm:$0xff]  ;;  %v8653_v20 = vand.u32 4294901760, %v12377_v0 }
 0xac8   :  { %v8656_v38 = vand.u32 4294901760, %v12382_v4 }
 0xaca   :  { %v12390_v39 = vpack.c.bf16 %v8656_v38, %v8653_v20 }
 0xacc   :  { %11295 = vmatprep.subr.bf16.mxu0 %v12390_v39 }
 0xacd   :  { %11297 = vmatpush3.bf16.msra.mxu0 %v12390_v39 }
 0xace   :  { %11299 = vmatprep.subr.bf16.mxu0 %v12412_v60 }
 0xad1   :  { %11301 = vmatpush3.bf16.msra.mxu0 %v12412_v60 }
 0xb53   :  { %v8005_v56 = vpop.xlane.xlu1 %8004 }
 0xb54   :  { %v8007_v11 = vmul.f32 0.03125, %v8005_v56  ;;  %v8002_v19 = vpop.xlane.xlu0 %8001 }
 0xb55   :  { %v8006_v13 = vmul.f32 0.03125, %v8002_v19  ;;  %v12532_v19 = vld [vmem:[%s12792_s16 + $0x78] sm:$0xff] }
 0xb56   :  { %v8009_v16 = vadd.f32 1e-05, %v8007_v11  ;;  %v12527_v11 = vld [vmem:[%s12792_s16 + $0x70] sm:$0xff] }
 0xb57   :  { %v8008_v17 = vadd.f32 1e-05, %v8006_v13  ;;  %v8695_v13 = vand.u32 4294901760, %v12527_v11 }
 0xb58   :  { %11620 = vrsqrt.f32 %v8009_v16  ;;  %v8698_v16 = vand.u32 4294901760, %v12532_v19 }
 0xb59   :  { %11622 = vrsqrt.f32 %v8008_v17 }
 0xb5a   :  { %v12544_v17 = vpack.c.bf16 %v8698_v16, %v8695_v13 }
 0xb62   :  { %v11621_v21 = vpop.eup %11620 }
 0xb63   :  { %v11623_v52 = vpop.eup %11622  ;;  %v8013_v54 = vmul.f32 %v11621_v21, %v7997_v33  ;;  %v12549_v21 = vsub.f32 %v12377_v0, %v8653_v20 }
 0xb64   :  { %v8012_v26 = vmul.f32 %v11623_v52, %v7996_v37 }
 0xb65   :  { %v8021_v28 = vmul.f32 %v9364_v24, %v8013_v54  ;;  %v8756_v52 = vand.u32 4294901760, %v12549_v21 }
 0xb66   :  { %v8020_v31 = vmul.f32 %v9364_v24, %v8012_v26  ;;  %v12554_v24 = vsub.f32 %v12382_v4, %v8656_v38 }
 0xb67   :  { %v8029_v12 = vadd.f32 %v9365_v30, %v8021_v28 }
 0xb68   :  { %v8028_v14 = vadd.f32 %v9365_v30, %v8020_v31  ;;  %v8763_v54 = vand.u32 4294901760, %v12554_v24  ;;  %v8757_v30 = vsub.f32 %v12549_v21, %v8756_v52  ;;  %v12569_v31 = vsub.f32 %v12395_v40, %v8659_v10 }
 0xb69   :  { %v8045_v23 = vsel %vm92_vm0, %v8029_v12, 0  ;;  %v12574_v12 = vsub.f32 %v12400_v29, %v8662_v41  ;;  %v8797_v40 = vsub.f32 %v12439_v55, %v8671_v58  ;;  %v8804_v10 = vsub.f32 %v12444_v57, %v8674_v59 }
 0xb6a   :  { %v8042_v32 = vsel %vm92_vm0, %v8028_v14, 0  ;;  %v8126_v22 = vand.u32 4294901760, %v8045_v23  ;;  %v12562_v26 = vpack.c.bf16 %v8763_v54, %v8756_v52  ;;  %v8764_v28 = vsub.f32 %v12554_v24, %v8763_v54 }
 0xb6b   :  { %v8116_v44 = vand.u32 4294901760, %v8042_v32  ;;  %v8758_v14 = vand.u32 4294901760, %v8757_v30  ;;  %v8811_v54 = vsub.f32 %v12461_v61, %v8677_v45  ;;  %v8818_v55 = vsub.f32 %v12466_v62, %v8680_v63 }
 0xb6c   :  { %v8127_v35 = vsub.f32 %v8045_v23, %v8126_v22  ;;  %v8765_v23 = vand.u32 4294901760, %v8764_v28  ;;  %v8832_v62 = vsub.f32 %v12488_v50, %v8686_v2 }
 0xb6d   :  { %v8117_v8 = vsub.f32 %v8042_v32, %v8116_v44  ;;  %v8770_v32 = vand.u32 4294901760, %v12569_v31  ;;  %v8812_v57 = vand.u32 4294901760, %v8811_v54  ;;  %v8819_v59 = vand.u32 4294901760, %v8818_v55 }
 0xb6e   :  { %v8128_v36 = vand.u32 4294901760, %v8127_v35 }
 0xb6f   :  { %v8118_v18 = vand.u32 4294901760, %v8117_v8 }
 0xb70   :  { %v8129_v33 = vsub.f32 %v8127_v35, %v8128_v36 }
 0xb71   :  { %v8119_v37 = vsub.f32 %v8117_v8, %v8118_v18 }
 0xb72   :  { %v8130_v6 = vand.u32 4294901760, %v8129_v33 }
 0xb73   :  { %v8120_v15 = vand.u32 4294901760, %v8119_v37 }
 0xb75   :  { %10546 = vmatprep.mubr.f32.mxu1 %v8120_v15 }
 0xb76   :  { %10547 = vmatmul.mubr.f32.vlgmr.msra.gmra.mrb[10].mxu1 %v8130_v6 }
 0xb77   :  { %11161 = vmatpush3.bf16.msra.mxu1 %v11158_v25  ;;  %10557 = vmatprep.mubr.f32.mxu1 %v8116_v44  ;;  %v12478_v25 = vpack.c.bf16 %v8680_v63, %v8677_v45 }
 0xb78   :  { %11163 = vmatprep.subr.bf16.mxu1 %v11162_v3 }
 0xb7b   :  { %11165 = vmatpush3.bf16.msra.mxu1 %v11162_v3  ;;  %v12500_v3 = vpack.c.bf16 %v8686_v2, %v8683_v1 }
 0xb7c   :  { %11167 = vmatprep.subr.bf16.mxu1 %v11166_v5 }
 0xb7e   :  { %10558 = vmatmul.mubr.f32.vlgmr.msra.gmra.mrb[10].mxu1 %v8126_v22 }
 0xb7f   :  { %11169 = vmatpush3.bf16.msra.mxu1 %v11166_v5  ;;  %10568 = vmatprep.mubr.f32.mxu1 %v8117_v8  ;;  %v12505_v5 = vld [vmem:[%s12792_s16 + $0x60] sm:$0xff] }
 0xb80   :  { %11171 = vmatprep.subr.bf16.mxu1 %v11170_v7 }
 0xb83   :  { %11173 = vmatpush3.bf16.msra.mxu1 %v11170_v7  ;;  %v12510_v7 = vld [vmem:[%s12792_s16 + $0x68] sm:$0xff] }
 0xb84   :  { %11175 = vmatprep.subr.bf16.mxu1 %v12350_v46 }
 0xb86   :  { %10569 = vmatmul.mubr.f32.vlgmr.msra.gmra.mrb[10].mxu1 %v8127_v35  ;;  %v8771_v35 = vsub.f32 %v12569_v31, %v8770_v32 }
 0xb87   :  { %11177 = vmatpush3.bf16.msra.mxu1 %v12350_v46  ;;  %10579 = vmatprep.mubr.f32.mxu1 %v8118_v18 }
 0xb88   :  { %11179 = vmatprep.subr.bf16.mxu1 %v12352_v48  ;;  %v8772_v37 = vand.u32 4294901760, %v8771_v35  ;;  %v8825_v35 = vsub.f32 %v12483_v47, %v8683_v1 }
 0xb8b   :  { %11181 = vmatpush3.bf16.msra.mxu1 %v12352_v48 }
 0xb8c   :  { %11183 = vmatprep.subr.bf16.mxu1 %v11182_v42 }
 0xb8e   :  { %10580 = vmatmul.mubr.f32.vlgmr.msra.gmra.mrb[10].mxu1 %v8128_v36 }
 0xb8f   :  { %11185 = vmatpush3.bf16.msra.mxu1 %v11182_v42  ;;  %10590 = vmatprep.mubr.f32.mxu1 %v8116_v44  ;;  %v8689_v42 = vand.u32 4294901760, %v12505_v5 }
 0xb90   :  { %11187 = vmatprep.subr.bf16.mxu1 %v11186_v9 }
 0xb93   :  { %11189 = vmatpush3.bf16.msra.mxu1 %v11186_v9  ;;  %v8692_v9 = vand.u32 4294901760, %v12510_v7 }
 0xb94   :  { %11191 = vmatprep.subr.bf16.mxu1 %v12350_v46 }
 0xb95   :  { %v12522_v56 = vpack.c.bf16 %v8692_v9, %v8689_v42  ;;  %v8846_v47 = vsub.f32 %v12510_v7, %v8692_v9  ;;  %v8860_v7 = vsub.f32 %v12532_v19, %v8698_v16  ;;  %v12662_v19 = vpack.c.bf16 %v12574_v12, %v12569_v31 }
 0xb96   :  { %10591 = vmatmul.mubr.f32.vlgmr.msra.gmra.mrb[10].mxu1 %v8126_v22  ;;  %v12668_v16 = vpack.c.bf16 %v8804_v10, %v8797_v40 }
 0xb97   :  { %11193 = vmatpush3.bf16.msra.mxu1 %v12350_v46  ;;  %10601 = vmatprep.mubr.f32.mxu1 %v8116_v44  ;;  %v12417_v46 = vld [vmem:[%s12792_s16 + $0x20] sm:$0xff]  ;;  %v12579_v44 = vpack.c.bf16 %v8765_v23, %v8758_v14  ;;  %v12620_v23 = vpack.c.bf16 %v8819_v59, %v8812_v57  ;;  %v8847_v2 = vand.u32 4294901760, %v8846_v47 }
 0xb98   :  { %11195 = vmatprep.subr.bf16.mxu1 %v12352_v48  ;;  %v8665_v49 = vand.u32 4294901760, %v12417_v46 }
 0xb9a   :  { %v12585_v8 = vsub.f32 %v12417_v46, %v8665_v49 }
 0xb9b   :  { %11197 = vmatpush3.bf16.msra.mxu1 %v12352_v48  ;;  %v12422_v48 = vld [vmem:[%s12792_s16 + $0x28] sm:$0xff] }
 0xb9c   :  { %11199 = vmatprep.subr.bf16.mxu1 %v12390_v39  ;;  %v8668_v51 = vand.u32 4294901760, %v12422_v48  ;;  %v8784_v15 = vand.u32 4294901760, %v12585_v8 }
 0xb9e   :  { %10602 = vmatmul.mubr.f32.vlgmr.msra.gmra.mrb[10].mxu1 %v8126_v22  ;;  %v12434_v53 = vpack.c.bf16 %v8668_v51, %v8665_v49  ;;  %v8777_v22 = vand.u32 4294901760, %v12574_v12  ;;  %v12590_v36 = vsub.f32 %v12422_v48, %v8668_v51  ;;  %v8785_v20 = vsub.f32 %v12585_v8, %v8784_v15 }
 0xb9f   :  { %11201 = vmatpush3.bf16.msra.mxu1 %v12390_v39  ;;  %v8798_v48 = vand.u32 4294901760, %v8797_v40  ;;  %v8805_v49 = vand.u32 4294901760, %v8804_v10 }
 0xba0   :  { %11203 = vmatprep.subr.bf16.mxu1 %v12412_v60  ;;  %11303 = vmatprep.subr.bf16.mxu0 %v12434_v53  ;;  %v12592_v18 = vpack.c.bf16 %v8777_v22, %v8770_v32  ;;  %v8778_v33 = vsub.f32 %v12574_v12, %v8777_v22  ;;  %v8791_v6 = vand.u32 4294901760, %v12590_v36  ;;  %v8786_v41 = vand.u32 4294901760, %v8785_v20 }
 0xba1   :  { %11305 = vmatpush3.bf16.msra.mxu0 %v12434_v53  ;;  %v8799_v52 = vsub.f32 %v8797_v40, %v8798_v48  ;;  %v12618_v58 = vpack.c.bf16 %v8805_v49, %v8798_v48  ;;  %v8806_v30 = vsub.f32 %v8804_v10, %v8805_v49  ;;  %v8813_v32 = vsub.f32 %v8811_v54, %v8812_v57 }
 0xba2   :  { %11307 = vmatprep.subr.bf16.mxu0 %v12456_v43  ;;  %v8779_v0 = vand.u32 4294901760, %v8778_v33  ;;  %v12598_v4 = vpack.c.bf16 %v8791_v6, %v8784_v15  ;;  %v8792_v38 = vsub.f32 %v12590_v36, %v8791_v6  ;;  %v8820_v22 = vsub.f32 %v8818_v55, %v8819_v59 }
 0xba3   :  { %11205 = vmatpush3.bf16.msra.mxu1 %v12412_v60  ;;  %v8800_v28 = vand.u32 4294901760, %v8799_v52  ;;  %v8807_v14 = vand.u32 4294901760, %v8806_v30  ;;  %v8814_v45 = vand.u32 4294901760, %v8813_v32  ;;  %v8826_v33 = vand.u32 4294901760, %v8825_v35 }
 0xba4   :  { %11207 = vmatprep.subr.bf16.mxu1 %v12434_v53  ;;  %v12605_v29 = vpack.c.bf16 %v8779_v0, %v8772_v37  ;;  %v8793_v46 = vand.u32 4294901760, %v8792_v38  ;;  %v8821_v63 = vand.u32 4294901760, %v8820_v22  ;;  %v8833_v37 = vand.u32 4294901760, %v8832_v62 }
 0xba5   :  { %11309 = vmatpush3.bf16.msra.mxu0 %v12456_v43  ;;  %v12625_v61 = vpack.c.bf16 %v8807_v14, %v8800_v28  ;;  %v8827_v6 = vsub.f32 %v8825_v35, %v8826_v33  ;;  %v8839_v0 = vsub.f32 %v12505_v5, %v8689_v42  ;;  %v8848_v49 = vsub.f32 %v8846_v47, %v8847_v2 }
 0xba6   :  { %11311 = vmatprep.subr.bf16.mxu0 %v12478_v25  ;;  %v12610_v51 = vpack.c.bf16 %v8793_v46, %v8786_v41  ;;  %v12630_v15 = vpack.c.bf16 %v8821_v63, %v8814_v45  ;;  %v12638_v1 = vpack.c.bf16 %v8833_v37, %v8826_v33  ;;  %v8834_v20 = vsub.f32 %v8832_v62, %v8833_v37 }
 0xba7   :  { %11209 = vmatpush3.bf16.msra.mxu1 %v12434_v53  ;;  %v8828_v38 = vand.u32 4294901760, %v8827_v6  ;;  %v8840_v50 = vand.u32 4294901760, %v8839_v0  ;;  %v8853_v52 = vsub.f32 %v12527_v11, %v8695_v13  ;;  %v8849_v9 = vand.u32 4294901760, %v8848_v49 }
 0xba8   :  { %11211 = vmatprep.subr.bf16.mxu1 %v12456_v43  ;;  %v8835_v41 = vand.u32 4294901760, %v8834_v20  ;;  %v8861_v28 = vand.u32 4294901760, %v8860_v7  ;;  %v12658_v11 = vpack.c.bf16 %v12554_v24, %v12549_v21  ;;  %v12666_v13 = vpack.c.bf16 %v12590_v36, %v12585_v8  ;;  %v9366_v21 = vld [vmem:[%s12791_s15] ss:$0 sm:$0xff] }
 0xba9   :  { %11313 = vmatpush3.bf16.msra.mxu0 %v12478_v25  ;;  %v12640_v46 = vpack.c.bf16 %v8847_v2, %v8840_v50  ;;  %v8841_v48 = vsub.f32 %v8839_v0, %v8840_v50  ;;  %v8854_v30 = vand.u32 4294901760, %v8853_v52  ;;  %v12670_v33 = vpack.c.bf16 %v8818_v55, %v8811_v54 }
 0xbaa   :  { %11315 = vmatprep.subr.bf16.mxu0 %v12500_v3  ;;  %v12645_v5 = vpack.c.bf16 %v8835_v41, %v8828_v38  ;;  %v8862_v32 = vsub.f32 %v8860_v7, %v8861_v28  ;;  %v12672_v37 = vpack.c.bf16 %v8832_v62, %v8825_v35  ;;  %v12674_v6 = vpack.c.bf16 %v8846_v47, %v8839_v0 }
 0xbab   :  { %11213 = vmatpush3.bf16.msra.mxu1 %v12456_v43  ;;  %v8842_v42 = vand.u32 4294901760, %v8841_v48  ;;  %v8855_v59 = vsub.f32 %v8853_v52, %v8854_v30  ;;  %v12652_v14 = vpack.c.bf16 %v8861_v28, %v8854_v30  ;;  %v12676_v20 = vpack.c.bf16 %v8860_v7, %v8853_v52 }
 0xbac   :  { %11215 = vmatprep.subr.bf16.mxu1 %v12478_v25  ;;  %v8863_v45 = vand.u32 4294901760, %v8862_v32 }
 0xbad   :  { %11317 = vmatpush3.bf16.msra.mxu0 %v12500_v3  ;;  %v12650_v57 = vpack.c.bf16 %v8849_v9, %v8842_v42  ;;  %v8856_v22 = vand.u32 4294901760, %v8855_v59 }
 0xbae   :  { %11319 = vmatprep.subr.bf16.mxu0 %v12522_v56 }
 0xbaf   :  { %11217 = vmatpush3.bf16.msra.mxu1 %v12478_v25  ;;  %v12654_v63 = vpack.c.bf16 %v8863_v45, %v8856_v22 }
 0xbb0   :  { %11219 = vmatprep.subr.bf16.mxu1 %v12500_v3 }
 0xbb1   :  { %11321 = vmatpush3.bf16.msra.mxu0 %v12522_v56 }
 0xbb2   :  { %11323 = vmatprep.subr.bf16.mxu0 %v12544_v17 }
 0xbb3   :  { %11221 = vmatpush3.bf16.msra.mxu1 %v12500_v3 }
 0xbb4   :  { %11223 = vmatprep.subr.bf16.mxu1 %v12522_v56 }
 0xbb5   :  { %11325 = vmatpush3.bf16.msra.mxu0 %v12544_v17 }
 0xbb6   :  { %11327 = vmatprep.subr.bf16.mxu0 %v12562_v26 }
 0xbb7   :  { %11225 = vmatpush3.bf16.msra.mxu1 %v12522_v56 }
 0xbb8   :  { %11227 = vmatprep.subr.bf16.mxu1 %v12544_v17 }
 0xbbb   :  { %11229 = vmatpush3.bf16.msra.mxu1 %v12544_v17 }
 0xbbc   :  { %11231 = vmatprep.subr.bf16.mxu1 %v12579_v44 }
 0xc71   :  { %v10603_v24 = vpop.f32.mrb[10].mxu1 }
 0xc72   :  { %v11396_v31 = vadd.f32 %v10603_v24, %v9366_v21  ;;  %v8565_v12 = vpop.f32.mrb[11].mxu1 }
 0xc73   :  { %v11397_v38 = vadd.f32 %v9366_v21, %v8565_v12 }
 0xc74   :  { %v8578_v8 = vmul.f32 0.70710677, %v11396_v31 }
 0xc75   :  { %v8577_v36 = vmul.f32 0.70710677, %v11397_v38 }
 0xc76   :  { %v8580_v40 = vand.u32 2147483647, %v8578_v8  ;;  %vm8620_vm3 = vcmp.ge.f32.partialorder %v8578_v8, 0.0 }
 0xc77   :  { %v8579_v10 = vand.u32 2147483647, %v8577_v36  ;;  %vm8619_vm4 = vcmp.ge.f32.partialorder %v8577_v36, 0.0 }
 0xc78   :  { %v8582_v54 = vmul.f32 0.3275911, %v8580_v40  ;;  %v8608_v0 = vsub.f32 0.0, %v8580_v40 }
 0xc79   :  { %v8581_v55 = vmul.f32 0.3275911, %v8579_v10  ;;  %v8607_v47 = vsub.f32 0.0, %v8579_v10 }
 0xc7a   :  { %v8584_v35 = vadd.f32 1.0, %v8582_v54  ;;  %v8610_v2 = vmul.f32 %v8608_v0, %v8580_v40 }
 0xc7b   :  { %v8583_v62 = vadd.f32 1.0, %v8581_v55  ;;  %v8609_v49 = vmul.f32 %v8607_v47, %v8579_v10 }
 0xc7c   :  { %11624 = vrcp.f32 %v8584_v35  ;;  %v8613_v42 = vmul.f32 1.442695, %v8610_v2 }
 0xc7d   :  { %11626 = vrcp.f32 %v8583_v62  ;;  %v8611_v28 = vmul.f32 1.442695, %v8609_v49 }
 0xc7e   :  { %11628 = vpow2.f32 %v8613_v42 }
 0xc7f   :  { %11630 = vpow2.f32 %v8611_v28 }
 0xc86   :  { %v11625_v50 = vpop.eup %11624 }
 0xc87   :  { %v11627_v41 = vpop.eup %11626  ;;  %v8590_v48 = vmul.f32 1.0614054, %v11625_v50 }
 0xc88   :  { %v8589_v52 = vmul.f32 1.0614054, %v11627_v41  ;;  %v11629_v62 = vpop.eup %11628 }
 0xc89   :  { %v8592_v7 = vadd.f32 -1.4531521, %v8590_v48  ;;  %v11631_v47 = vpop.eup %11630 }
 0xc8a   :  { %v8591_v9 = vadd.f32 -1.4531521, %v8589_v52 }
 0xc8b   :  { %v8594_v30 = vmul.f32 %v11625_v50, %v8592_v7 }
 0xc8c   :  { %v8593_v59 = vmul.f32 %v11627_v41, %v8591_v9 }
 0xc8d   :  { %v8596_v32 = vadd.f32 1.4214138, %v8594_v30  ;;  %v8576_v30 = vmul.f32 0.5, %v11396_v31 }
 0xc8e   :  { %v8595_v22 = vadd.f32 1.4214138, %v8593_v59 }
 0xc8f   :  { %v8598_v45 = vmul.f32 %v11625_v50, %v8596_v32  ;;  %v8575_v32 = vmul.f32 0.5, %v11397_v38 }
 0xc90   :  { %v8597_v21 = vmul.f32 %v11627_v41, %v8595_v22 }
 0xc91   :  { %v8600_v24 = vadd.f32 -0.28449672, %v8598_v45 }
 0xc92   :  { %v8599_v12 = vadd.f32 -0.28449672, %v8597_v21 }
 0xc93   :  { %v8602_v54 = vmul.f32 %v11625_v50, %v8600_v24 }
 0xc94   :  { %v8601_v40 = vmul.f32 %v11627_v41, %v8599_v12 }
 0xc95   :  { %v8604_v55 = vadd.f32 0.2548296, %v8602_v54 }
 0xc96   :  { %v8603_v35 = vadd.f32 0.2548296, %v8601_v40 }
 0xc97   :  { %v8606_v10 = vmul.f32 %v11625_v50, %v8604_v55 }
 0xc98   :  { %v8605_v0 = vmul.f32 %v11627_v41, %v8603_v35 }
 0xc99   :  { %v8616_v2 = vmul.f32 %v11629_v62, %v8606_v10 }
 0xc9a   :  { %v8615_v48 = vmul.f32 %v11631_v47, %v8605_v0 }
 0xc9b   :  { %v8618_v49 = vsub.f32 1.0, %v8616_v2 }
 0xc9c   :  { %v8617_v52 = vsub.f32 1.0, %v8615_v48 }
 0xc9d   :  { %v8622_v7 = vsub.f32 0.0, %v8618_v49 }
 0xc9e   :  { %v8621_v42 = vsub.f32 0.0, %v8617_v52 }
 0xc9f   :  { %v8624_v9 = vsel %vm8620_vm3, %v8618_v49, %v8622_v7 }
 0xca0   :  { %v8626_v28 = vadd.f32 1.0, %v8624_v9  ;;  %v8623_v59 = vsel %vm8619_vm4, %v8617_v52, %v8621_v42 }
 0xca1   :  { %v8625_v22 = vadd.f32 1.0, %v8623_v59 }
 0xca2   :  { %v8628_v45 = vmul.f32 %v8626_v28, %v8576_v30 }
 0xca3   :  { %v8627_v21 = vmul.f32 %v8625_v22, %v8575_v32 }
 0xca4   :  { %v12681_v50 = vand.u32 4294901760, %v8628_v45 }
 0xca5   :  { %v8733_v41 = vand.u32 4294901760, %v8627_v21 }
 0xca6   :  { %v12684_v24 = vsub.f32 %v8628_v45, %v12681_v50 }
 0xca7   :  { %v8734_v12 = vsub.f32 %v8627_v21, %v8733_v41 }
 0xca8   :  { %v8745_v54 = vand.u32 4294901760, %v12684_v24 }
 0xca9   :  { %v8735_v8 = vand.u32 4294901760, %v8734_v12 }
 0xcaa   :  { %v8746_v40 = vsub.f32 %v12684_v24, %v8745_v54 }
 0xcab   :  { %10741 = vmatprep.mubr.f32.mxu0 %v8735_v8  ;;  %v8736_v31 = vsub.f32 %v8734_v12, %v8735_v8 }
 0xcac   :  { %10742 = vmatmul.mubr.f32.vlgmr.msra.gmra.mrb[14].mxu0 %v8745_v54  ;;  %v8747_v36 = vand.u32 4294901760, %v8746_v40 }
 0xcad   :  { %11329 = vmatpush3.bf16.msra.mxu0 %v12562_v26  ;;  %10776 = vmatprep.mubr.f32.mxu0 %v8733_v41  ;;  %v8737_v38 = vand.u32 4294901760, %v8736_v31 }
 0xcae   :  { %11331 = vmatprep.subr.bf16.mxu0 %v12592_v18 }
 0xcaf   :  { %10636 = vmatprep.mubr.f32.mxu1 %v8737_v38 }
 0xcb0   :  { %10637 = vmatmul.mubr.f32.vlgmr.msra.gmra.mrb[12].mxu1 %v8747_v36 }
 0xcb1   :  { %11233 = vmatpush3.bf16.msra.mxu1 %v12579_v44  ;;  %11333 = vmatpush3.bf16.msra.mxu0 %v12592_v18 }
 0xcb2   :  { %10671 = vmatprep.mubr.f32.mxu1 %v8733_v41  ;;  %11235 = vmatprep.subr.bf16.mxu1 %v12605_v29 }
 0xcb3   :  { %11335 = vmatprep.subr.bf16.mxu0 %v12598_v4 }
 0xcb5   :  { %11237 = vmatpush3.bf16.msra.mxu1 %v12605_v29  ;;  %11337 = vmatpush3.bf16.msra.mxu0 %v12598_v4 }
 0xcb6   :  { %11239 = vmatprep.subr.bf16.mxu1 %v12610_v51  ;;  %11339 = vmatprep.subr.bf16.mxu0 %v12618_v58 }
 0xcb9   :  { %11241 = vmatpush3.bf16.msra.mxu1 %v12610_v51  ;;  %11341 = vmatpush3.bf16.msra.mxu0 %v12618_v58 }
 0xcba   :  { %11243 = vmatprep.subr.bf16.mxu1 %v12625_v61  ;;  %11343 = vmatprep.subr.bf16.mxu0 %v12620_v23 }
 0xcbd   :  { %11245 = vmatpush3.bf16.msra.mxu1 %v12625_v61  ;;  %11345 = vmatpush3.bf16.msra.mxu0 %v12620_v23 }
 0xcbe   :  { %11247 = vmatprep.subr.bf16.mxu1 %v12630_v15  ;;  %11347 = vmatprep.subr.bf16.mxu0 %v12638_v1 }
 0xcc1   :  { %11249 = vmatpush3.bf16.msra.mxu1 %v12630_v15  ;;  %11349 = vmatpush3.bf16.msra.mxu0 %v12638_v1 }
 0xcc2   :  { %11251 = vmatprep.subr.bf16.mxu1 %v12645_v5  ;;  %11351 = vmatprep.subr.bf16.mxu0 %v12640_v46 }
 0xcc5   :  { %11253 = vmatpush3.bf16.msra.mxu1 %v12645_v5  ;;  %11353 = vmatpush3.bf16.msra.mxu0 %v12640_v46 }
 0xcc6   :  { %11255 = vmatprep.subr.bf16.mxu1 %v12650_v57  ;;  %11355 = vmatprep.subr.bf16.mxu0 %v12652_v14 }
 0xcc9   :  { %11257 = vmatpush3.bf16.msra.mxu1 %v12650_v57  ;;  %11357 = vmatpush3.bf16.msra.mxu0 %v12652_v14 }
 0xcca   :  { %11259 = vmatprep.subr.bf16.mxu1 %v12654_v63  ;;  %11359 = vmatprep.subr.bf16.mxu0 %v12390_v39 }
 0xccc   :  { %10777 = vmatmul.mubr.f32.vlgmr.msra.gmra.mrb[14].mxu0 %v12681_v50 }
 0xccd   :  { %11261 = vmatpush3.bf16.msra.mxu1 %v12654_v63  ;;  %11361 = vmatpush3.bf16.msra.mxu0 %v12390_v39 }
 0xcce   :  { %10811 = vmatprep.mubr.f32.mxu0 %v8733_v41  ;;  %11263 = vmatprep.subr.bf16.mxu1 %v12658_v11 }
 0xccf   :  { %11363 = vmatprep.subr.bf16.mxu0 %v12412_v60 }
 0xcd0   :  { %10672 = vmatmul.mubr.f32.vlgmr.msra.gmra.mrb[12].mxu1 %v12681_v50 }
 0xcd1   :  { %11265 = vmatpush3.bf16.msra.mxu1 %v12658_v11  ;;  %10706 = vmatprep.mubr.f32.mxu1 %v8734_v12 }
 0xcd2   :  { %11365 = vmatpush3.bf16.msra.mxu0 %v12412_v60  ;;  %11267 = vmatprep.subr.bf16.mxu1 %v12662_v19 }
 0xcd3   :  { %11367 = vmatprep.subr.bf16.mxu0 %v12434_v53 }
 0xcd5   :  { %11269 = vmatpush3.bf16.msra.mxu1 %v12662_v19 }
 0xcd6   :  { %11369 = vmatpush3.bf16.msra.mxu0 %v12434_v53  ;;  %11271 = vmatprep.subr.bf16.mxu1 %v12666_v13  ;;  %v9367_v53 = vld [vmem:[%s12806_s18] ss:$0 sm:$0xff] }
 0xcd7   :  { %11371 = vmatprep.subr.bf16.mxu0 %v12456_v43 }
 0xcd9   :  { %11273 = vmatpush3.bf16.msra.mxu1 %v12666_v13 }
 0xcda   :  { %11373 = vmatpush3.bf16.msra.mxu0 %v12456_v43  ;;  %11275 = vmatprep.subr.bf16.mxu1 %v12668_v16 }
 0xcdb   :  { %11375 = vmatprep.subr.bf16.mxu0 %v12478_v25 }
 0xcdd   :  { %11277 = vmatpush3.bf16.msra.mxu1 %v12668_v16 }
 0xcde   :  { %11377 = vmatpush3.bf16.msra.mxu0 %v12478_v25  ;;  %11279 = vmatprep.subr.bf16.mxu1 %v12670_v33 }
 0xcdf   :  { %11379 = vmatprep.subr.bf16.mxu0 %v12500_v3 }
 0xce1   :  { %11281 = vmatpush3.bf16.msra.mxu1 %v12670_v33 }
 0xce2   :  { %11381 = vmatpush3.bf16.msra.mxu0 %v12500_v3  ;;  %11283 = vmatprep.subr.bf16.mxu1 %v12672_v37 }
 0xce3   :  { %11383 = vmatprep.subr.bf16.mxu0 %v12522_v56 }
 0xce5   :  { %11285 = vmatpush3.bf16.msra.mxu1 %v12672_v37 }
 0xce6   :  { %11385 = vmatpush3.bf16.msra.mxu0 %v12522_v56  ;;  %11287 = vmatprep.subr.bf16.mxu1 %v12674_v6 }
 0xce7   :  { %11387 = vmatprep.subr.bf16.mxu0 %v12544_v17 }
 0xce9   :  { %11289 = vmatpush3.bf16.msra.mxu1 %v12674_v6 }
 0xcea   :  { %11389 = vmatpush3.bf16.msra.mxu0 %v12544_v17  ;;  %11291 = vmatprep.subr.bf16.mxu1 %v12676_v20 }
 0xced   :  { %10812 = vmatmul.mubr.f32.vlgmr.msra.gmra.mrb[14].mxu0 %v12681_v50  ;;  %11293 = vmatpush3.bf16.msra.mxu1 %v12676_v20 }
 0xcf0   :  { %10707 = vmatmul.mubr.f32.vlgmr.msra.gmra.mrb[12].mxu1 %v12684_v24 }
 0xdc0   :  { %v10813_v39 = vpop.f32.mrb[14].mxu0 }
 0xdc1   :  { %v9326_v60 = vpop.f32.mrb[15].mxu0 }
 0xdc3   :  { %v10708_v43 = vpop.f32.mrb[12].mxu1 }
 0xdc4   :  { %v11398_v25 = vadd.f32 %v10708_v43, %v9367_v53  ;;  %v9010_v3 = vpop.f32.mrb[13].mxu1 }
 0xdc5   :  { %v11400_v56 = vadd.f32 %v9367_v53, %v9010_v3 }
 0xdc6   :  { %v11399_v26 = vadd.f32 %v11398_v25, %v10813_v39 }
 0xdc7   :  { %v11401_v17 = vadd.f32 %v11400_v56, %v9326_v60 }
 0xdc8   :  { %v9337_v44 = vadd.f32 %v11399_v26, %v12326_v27 }
 0xdc9   :  { %v9336_v18 = vadd.f32 %v11401_v17, %v12328_v34 }
 0xdca   :  { %9339 = vst.msk [vmem:[#allocation7 + $0x8] sm:$0xff] %vm92_vm0, %v9337_v44 }
 0xdcb   :  { %9338 = vst.msk [vmem:[#allocation7] sm:$0xff] %vm92_vm0, %v9336_v18 }
 0xdcc   :  { %11689 = shalt.err (!%p11686_p6)
}
 0xdcd   :  { %s12807_s10 = sld [smem:[#allocation15_spill]] }
 0xdd3   :  { %s11690_s30 = scalar_lea.hbm %s12807_s10, 256 }
 0xdd4   :  { %p11691_p7 = scmp.ne.s32.totalorder %s12807_s10, %s11690_s30  ;;  %p11694_p8 = scmp.lt.u32.totalorder %s11690_s30, %s12807_s10 }
 0xdd6   :  { %p11696_p9 = pnand %p11694_p8, %p11691_p7 }
 0xdd8   :  { %11699 = shalt.err (!%p11696_p9)
}
 0xdd9   :  { %9351 = dma.vmem_to_hbm [thread:$0]  %s9346_s26, 256, %s12807_s10, [#allocation4], %s11707_s23, %s11707_s23, %s11708_s24  }
 0xdda   :  { %11704 = dma.done.wait [#allocation4], 256  }
 0xddb   :  { %11705 = vsyncadd [#allocation4], 4294967040 }
 0xddc   :  { %9355 = vsyncpa [#allocation3], 1 }
 0xddd   :  { %9356 = vsyncpa [#allocation6], 1 }
 0xdde   :  { %9357 = vsyncpa [#allocation4], 1 }

</bundles_post_ra>
